<compile_context>
chip_gen: v5e
topology: v5e:2x2
jax: 0.10.0
libtpu: 0.0.40
codegen_flags: <defaults>
</compile_context>

<pallas_src>
import functools
from types import SimpleNamespace

import jax
import jax.numpy as jnp
from jax.experimental import pallas as pl
from jax.experimental.pallas import tpu as pltpu


# ----------------------------------------------------------------------------
# helpers
# ----------------------------------------------------------------------------
def _cdiv(a, b):
    return -(-a // b)


def _round_up(x, m):
    return ((x + m - 1) // m) * m


def _scalar_smem_spec():
    return pl.BlockSpec((1, 1), lambda *_: (0, 0),
                        memory_space=pltpu.MemorySpace.SMEM)


def _elementwise_loss(d, loss_type):
    if loss_type == 'l1':
        return jnp.abs(d)
    if loss_type in ('mse', 'l2'):
        return d * d
    if loss_type == 'smooth_l1':                 # PyTorch default beta = 1.0
        a = jnp.abs(d)
        return jnp.where(a < 1.0, 0.5 * d * d, a - 0.5)
    raise ValueError(f'Unsupported loss type: {loss_type}')


# ----------------------------------------------------------------------------
# Fused small-loss kernel: 7 regress losses + geometry (p2p, planarity)
# ----------------------------------------------------------------------------
SMALL_KEYS = ['rotation', 'theta', 'cabin_size', 'chasis_size',
              'bucket_size', 'other_offset', 'keypoints']
_ROT_IDX = SMALL_KEYS.index('rotation')
_OFF_IDX = SMALL_KEYS.index('other_offset')
_KP_IDX = SMALL_KEYS.index('keypoints')


def _cross3(u, v):
    return jnp.concatenate([
        u[:, 1:2] * v[:, 2:3] - u[:, 2:3] * v[:, 1:2],
        u[:, 2:3] * v[:, 0:1] - u[:, 0:1] * v[:, 2:3],
        u[:, 0:1] * v[:, 1:2] - u[:, 1:2] * v[:, 0:1]], axis=1)


def _geometry_losses_body(kp, r6, off):
    eps = 1e-6
    b = kp.shape[0]

    # vector6d_to_rotation_matrix (Gram-Schmidt), columns [b1 | b2 | b3]
    a1, a2 = r6[:, 0:3], r6[:, 3:6]
    b1 = a1 / (jnp.sqrt(jnp.sum(a1 * a1, axis=1, keepdims=True)) + 1e-8)
    u2 = a2 - jnp.sum(b1 * a2, axis=1, keepdims=True) * b1
    b2 = u2 / (jnp.sqrt(jnp.sum(u2 * u2, axis=1, keepdims=True)) + 1e-8)
    b3 = _cross3(b1, b2)

    p = [kp[:, 3 * k:3 * k + 3] for k in range(4)]
    # kps_[:, 0] = kps[:, 0] + R[:, :, 2]*off[:, 0] + R[:, :, 1]*off[:, 1]
    p0 = p[0] + b3 * off[:, 0:1] + b2 * off[:, 1:2]
    pts = [p0, p[1], p[2], p[3]]

    # Points2PlaneLoss: plane normal = R @ [0, 1, 0]^T = b2 (column 1)
    nrm = b2 / (jnp.sqrt(jnp.sum(b2 * b2, axis=1, keepdims=True)) + eps)
    vecs = [pts[1] - pts[0], pts[2] - pts[1], pts[3] - pts[2],
            pts[2] - pts[0], pts[3] - pts[0]]
    sq = jnp.concatenate(
        [jnp.sum(v * nrm, axis=1, keepdims=True) ** 2 for v in vecs], axis=1)
    p2p = jnp.sum(sq) / float(b * 5)

    # PlanarityLoss
    def planarity(q1, q2, q3, q4):
        n = _cross3(q2 - q1, q3 - q1)
        n = n / (jnp.sqrt(jnp.sum(n * n, axis=1, keepdims=True)) + eps)
        d = jnp.sum(n * (q4 - q1), axis=1, keepdims=True)
        return d * d

    plan_per_b = (planarity(pts[0], pts[1], pts[2], pts[3]) +
                  planarity(pts[1], pts[2], pts[3], pts[0]) +
                  planarity(pts[2], pts[3], pts[0], pts[1]) +
                  planarity(pts[3], pts[0], pts[1], pts[2])) / 4.0
    plan = jnp.sum(plan_per_b) / float(b)
    return p2p, plan


def _make_fused_small_kernel(loss_types):
    n_in = 2 * len(loss_types)

    def kernel(*refs):
        in_refs = refs[:n_in]
        out_refs = refs[n_in:]
        preds = []
        for idx, lt in enumerate(loss_types):
            p = in_refs[2 * idx][...].astype(jnp.float32)
            g = in_refs[2 * idx + 1][...].astype(jnp.float32)
            preds.append(p)
            e = _elementwise_loss(p - g, lt)
            out_refs[idx][0, 0] = jnp.sum(e) / float(e.size)
        p2p, plan = _geometry_losses_body(
            preds[_KP_IDX], preds[_ROT_IDX], preds[_OFF_IDX])
        out_refs[len(loss_types)][0, 0] = p2p
        out_refs[len(loss_types) + 1][0, 0] = plan

    return kernel


def fused_small_losses(pred_dict, target_dict, loss_info):
    """One pallas_call for all tiny per-batch losses + the geometry losses."""
    loss_types = [loss_info[k]['loss_type'] for k in SMALL_KEYS]
    args, in_specs = [], []
    for k in SMALL_KEYS:
        for t in (pred_dict[k], target_dict[k]):
            t2 = t.reshape(t.shape[0], -1)       # all small tensors are (b, k)
            args.append(t2)
            in_specs.append(pl.BlockSpec(t2.shape, lambda i: (0, 0)))
    n_out = len(SMALL_KEYS) + 2
    outs = pl.pallas_call(
        _make_fused_small_kernel(loss_types),
        out_shape=tuple(jax.ShapeDtypeStruct((1, 1), jnp.float32)
                        for _ in range(n_out)),
        grid=(1,),
        in_specs=in_specs,
        out_specs=tuple(_scalar_smem_spec() for _ in range(n_out)),
        compiler_params=pltpu.CompilerParams(
            dimension_semantics=("arbitrary",)),
    )(*args)
    rec = {k: outs[i][0, 0] for i, k in enumerate(SMALL_KEYS)}
    rec['point2plane'] = outs[len(SMALL_KEYS)][0, 0]
    rec['planarity'] = outs[len(SMALL_KEYS) + 1][0, 0]
    return rec


# ----------------------------------------------------------------------------
# Tiled big regress reduction (heatmap): grid + accumulator, 'mean'
# ----------------------------------------------------------------------------
def _regress_tiled_kernel(p_ref, g_ref, out_ref, acc_ref, *,
                          loss_type, inv_count):
    i = pl.program_id(0)

    @pl.when(i == 0)
    def _():
        acc_ref[...] = jnp.zeros_like(acc_ref)

    d = p_ref[...].astype(jnp.float32) - g_ref[...].astype(jnp.float32)
    e = _elementwise_loss(d, loss_type)
    acc_ref[...] += jnp.sum(e)

    @pl.when(i == pl.num_programs(0) - 1)
    def _():
        out_ref[0, 0] = acc_ref[0, 0] * inv_count


def regress_loss_big(pred, gt, loss_type, *, max_tile_rows=512):
    """Mean regression loss over a large tensor: flatten to a lane-dense
    (rows, 128) slab (zero padded; zeros contribute 0 to the sum), tile rows
    over a pipelined grid, divide by the TRUE element count."""
    n = int(pred.size)
    lanes = 128
    rows = _cdiv(n, lanes)
    grid_n = _cdiv(rows, max_tile_rows)
    tile_rows = _round_up(_cdiv(rows, grid_n), 8)
    rows_p = grid_n * tile_rows

    def prep(x):
        flat = x.reshape(-1)
        pad = rows_p * lanes - n
        if pad:
            flat = jnp.pad(flat, (0, pad))
        return flat.reshape(rows_p, lanes)

    out = pl.pallas_call(
        functools.partial(_regress_tiled_kernel, loss_type=loss_type,
                          inv_count=1.0 / n),
        out_shape=jax.ShapeDtypeStruct((1, 1), jnp.float32),
        grid=(grid_n,),
        in_specs=[pl.BlockSpec((tile_rows, lanes), lambda i: (i, 0)),
                  pl.BlockSpec((tile_rows, lanes), lambda i: (i, 0))],
        out_specs=_scalar_smem_spec(),
        scratch_shapes=[pltpu.VMEM((1, 1), jnp.float32)],
        compiler_params=pltpu.CompilerParams(
            dimension_semantics=("arbitrary",)),
    )(prep(pred), prep(gt))
    return out[0, 0]


# ----------------------------------------------------------------------------
# Vector loss: mask computed in-kernel from the (1/3-size) heatmap
# ----------------------------------------------------------------------------
def _vector_masked_kernel(p_ref, g_ref, hm_ref, out_ref, acc_ref, *,
                          loss_type, thre, inv_count):
    i = pl.program_id(0)

    @pl.when(i == 0)
    def _():
        acc_ref[...] = jnp.zeros_like(acc_ref)

    m = (hm_ref[...].astype(jnp.float32) > thre).astype(jnp.float32)  # (1,1,hw)
    d = (p_ref[...].astype(jnp.float32)
         - g_ref[...].astype(jnp.float32)) * m       # mask broadcast over 3 ch
    e = _elementwise_loss(d, loss_type)
    acc_ref[...] += jnp.sum(e)

    @pl.when(i == pl.num_programs(0) - 1)
    def _():
        out_ref[0, 0] = acc_ref[0, 0] * inv_count


def vector_masked_loss(pred_vec, gt_vec, heatmap, loss_type, hm_thre):
    """vector: (b, 3K, H, W); mask = repeat_interleave(heatmap, 3, dim=1) > thre.
    The repeat is done implicitly in-kernel via broadcast; the mask never hits
    HBM.  'mean' divides by the total element count (matches torch)."""
    b, c3, h, w = pred_vec.shape
    k = c3 // 3
    hw = h * w
    pv = pred_vec.reshape(b * k, 3, hw)
    gv = gt_vec.reshape(b * k, 3, hw)
    hm = heatmap.reshape(b * k, 1, hw)
    out = pl.pallas_call(
        functools.partial(_vector_masked_kernel, loss_type=loss_type,
                          thre=float(hm_thre),
                          inv_count=1.0 / int(pred_vec.size)),
        out_shape=jax.ShapeDtypeStruct((1, 1), jnp.float32),
        grid=(b * k,),
        in_specs=[pl.BlockSpec((1, 3, hw), lambda i: (i, 0, 0)),
                  pl.BlockSpec((1, 3, hw), lambda i: (i, 0, 0)),
                  pl.BlockSpec((1, 1, hw), lambda i: (i, 0, 0))],
        out_specs=_scalar_smem_spec(),
        scratch_shapes=[pltpu.VMEM((1, 1), jnp.float32)],
        compiler_params=pltpu.CompilerParams(
            dimension_semantics=("arbitrary",)),
    )(pv, gv, hm)
    return out[0, 0]


# ----------------------------------------------------------------------------
# SegmentationLoss: tiled cross entropy with ignore_index, mean over valid rows
# ----------------------------------------------------------------------------
def _ce_tiled_kernel(logits_ref, labels_ref, out_ref, sum_ref, cnt_ref, *,
                     ignore_index):
    i = pl.program_id(0)

    @pl.when(i == 0)
    def _():
        sum_ref[...] = jnp.zeros_like(sum_ref)
        cnt_ref[...] = jnp.zeros_like(cnt_ref)

    logits = logits_ref[...].astype(jnp.float32)          # (tn, s)
    labels = labels_ref[...]                              # (tn, 1) int32
    tn, s = logits.shape
    mx = jnp.max(logits, axis=1, keepdims=True)
    lse = jnp.log(jnp.sum(jnp.exp(logits - mx), axis=1, keepdims=True)) + mx
    cls = jax.lax.broadcasted_iota(jnp.int32, (tn, s), 1)
    onehot = (cls == labels).astype(jnp.float32)
    picked = jnp.sum(onehot * logits, axis=1, keepdims=True)
    valid = (labels != ignore_index).astype(jnp.float32)
    sum_ref[...] += jnp.sum((lse - picked) * valid)
    cnt_ref[...] += jnp.sum(valid)

    @pl.when(i == pl.num_programs(0) - 1)
    def _():
        # NOTE: returns 0 when every label is ignore_index (torch gives NaN).
        out_ref[0, 0] = sum_ref[0, 0] / jnp.maximum(cnt_ref[0, 0], 1.0)


def segmentation_loss(logits, labels, ignore_index=-100, *, max_tile_rows=1024):
    if logits.ndim > 2:
        logits = logits.reshape(-1, logits.shape[-1])
    labels = labels.reshape(-1, 1).astype(jnp.int32)
    n, s = logits.shape
    grid_n = _cdiv(n, max_tile_rows)
    tile_n = _round_up(_cdiv(n, grid_n), 8)
    n_p = grid_n * tile_n
    if n_p != n:
        logits = jnp.pad(logits, ((0, n_p - n), (0, 0)))
        labels = jnp.pad(labels, ((0, n_p - n), (0, 0)),
                         constant_values=ignore_index)
    out = pl.pallas_call(
        functools.partial(_ce_tiled_kernel, ignore_index=ignore_index),
        out_shape=jax.ShapeDtypeStruct((1, 1), jnp.float32),
        grid=(grid_n,),
        in_specs=[pl.BlockSpec((tile_n, s), lambda i: (i, 0)),
                  pl.BlockSpec((tile_n, 1), lambda i: (i, 0))],
        out_specs=_scalar_smem_spec(),
        scratch_shapes=[pltpu.VMEM((1, 1), jnp.float32),
                        pltpu.VMEM((1, 1), jnp.float32)],
        compiler_params=pltpu.CompilerParams(
            dimension_semantics=("arbitrary",)),
    )(logits, labels)
    return out[0, 0]


# ----------------------------------------------------------------------------
# SupervisedLoss.forward
# ----------------------------------------------------------------------------
REGRESS_NAMES = ['rotation', 'theta', 'cabin_size', 'chasis_size',
                 'bucket_size', 'other_offset']


def supervised_loss(pred_dict, target_dict, loss_info, cfg):
    record = {}
    total = jnp.float32(0.0)

    def add(name, val):
        nonlocal total
        record[name] = val
        total = total + val * loss_info[name]['weight']

    # all tiny per-batch losses + both geometric losses -> ONE pallas_call
    small = fused_small_losses(pred_dict, target_dict, loss_info)
    for key in REGRESS_NAMES:
        add(key, small[key])
    add('keypoints', small['keypoints'])
    add('point2plane', small['point2plane'])
    add('planarity', small['planarity'])

    add('segment', segmentation_loss(pred_dict['segment'],
                                     target_dict['segment']))

    add('heatmap', regress_loss_big(pred_dict['heatmap'],
                                    target_dict['heatmap'],
                                    loss_info['heatmap']['loss_type']))

    # vector: in-kernel mask from the heatmap (no HBM-materialized mask)
    add('vector', vector_masked_loss(pred_dict['vector'],
                                     target_dict['vector'],
                                     target_dict['heatmap'],
                                     loss_info['vector']['loss_type'],
                                     cfg.hm_thre))

    record['total'] = total
    return total, record


# ----------------------------------------------------------------------------
# main
# ----------------------------------------------------------------------------
if __name__ == "__main__":
    loss_info = {
        'rotation':     {'loss_type': 'mse',       'weight': 1.0},
        'theta':        {'loss_type': 'l1',        'weight': 1.0},
        'cabin_size':   {'loss_type': 'smooth_l1', 'weight': 1.0},
        'chasis_size':  {'loss_type': 'mse',       'weight': 1.0},
        'bucket_size':  {'loss_type': 'mse',       'weight': 1.0},
        'other_offset': {'loss_type': 'l1',        'weight': 1.0},
        'keypoints':    {'loss_type': 'mse',       'weight': 1.0},
        'point2plane':  {'weight': 0.1},
        'planarity':    {'weight': 0.1},
        'segment':      {'weight': 1.0},
        'heatmap':      {'loss_type': 'mse',       'weight': 1.0},
        'vector':       {'loss_type': 'l1',        'weight': 1.0},
    }
    cfg = SimpleNamespace(hm_thre=0.5)

    b, n_pts, n_cls, K, H, W = 2, 64, 5, 4, 16, 16
    key = jax.random.PRNGKey(0)
    ks = jax.random.split(key, 24)

    pred_dict = {
        'rotation':     jax.random.normal(ks[0],  (b, 6),  jnp.float32),
        'theta':        jax.random.normal(ks[1],  (b, 1),  jnp.float32),
        'cabin_size':   jax.random.normal(ks[2],  (b, 3),  jnp.float32),
        'chasis_size':  jax.random.normal(ks[3],  (b, 3),  jnp.float32),
        'bucket_size':  jax.random.normal(ks[4],  (b, 3),  jnp.float32),
        'other_offset': jax.random.normal(ks[5],  (b, 2),  jnp.float32),
        'keypoints':    jax.random.normal(ks[6],  (b, 12), jnp.float32),
        'segment':      jax.random.normal(ks[7],  (b, n_pts, n_cls), jnp.float32),
        'heatmap':      jax.random.normal(ks[8],  (b, K, H, W),      jnp.float32),
        'vector':       jax.random.normal(ks[9],  (b, 3 * K, H, W),  jnp.float32),
    }

    seg_gt = jax.random.randint(ks[17], (b, n_pts), 0, n_cls, jnp.int32)
    seg_gt = seg_gt.at[0, :4].set(-100)      # exercise ignore_index
    target_dict = {
        'rotation':     jax.random.normal(ks[10], (b, 6),  jnp.float32),
        'theta':        jax.random.normal(ks[11], (b, 1),  jnp.float32),
        'cabin_size':   jax.random.normal(ks[12], (b, 3),  jnp.float32),
        'chasis_size':  jax.random.normal(ks[13], (b, 3),  jnp.float32),
        'bucket_size':  jax.random.normal(ks[14], (b, 3),  jnp.float32),
        'other_offset': jax.random.normal(ks[15], (b, 2),  jnp.float32),
        'keypoints':    jax.random.normal(ks[16], (b, 12), jnp.float32),
        'segment':      seg_gt,
        'heatmap':      jax.random.uniform(ks[18], (b, K, H, W),     jnp.float32),
        'vector':       jax.random.normal(ks[19], (b, 3 * K, H, W),  jnp.float32),
    }

    total, record = supervised_loss(pred_dict, target_dict, loss_info, cfg)
    total = jax.block_until_ready(total)
    record = {k: float(jax.block_until_ready(v)) for k, v in record.items()}
    assert jnp.isfinite(total)
    print("KERNEL_OK")
</pallas_src>

<mosaic_0001>
module attributes {stable_mosaic.version = 11 : i64} {
  func.func @kernel(%arg0: i32, %arg1: memref<2x6xf32, #tpu.memory_space<vmem>>, %arg2: memref<2x6xf32, #tpu.memory_space<vmem>>, %arg3: memref<2x1xf32, #tpu.memory_space<vmem>>, %arg4: memref<2x1xf32, #tpu.memory_space<vmem>>, %arg5: memref<2x3xf32, #tpu.memory_space<vmem>>, %arg6: memref<2x3xf32, #tpu.memory_space<vmem>>, %arg7: memref<2x3xf32, #tpu.memory_space<vmem>>, %arg8: memref<2x3xf32, #tpu.memory_space<vmem>>, %arg9: memref<2x3xf32, #tpu.memory_space<vmem>>, %arg10: memref<2x3xf32, #tpu.memory_space<vmem>>, %arg11: memref<2x2xf32, #tpu.memory_space<vmem>>, %arg12: memref<2x2xf32, #tpu.memory_space<vmem>>, %arg13: memref<2x12xf32, #tpu.memory_space<vmem>>, %arg14: memref<2x12xf32, #tpu.memory_space<vmem>>, %arg15: memref<1x1xf32, #tpu.memory_space<smem>>, %arg16: memref<1x1xf32, #tpu.memory_space<smem>>, %arg17: memref<1x1xf32, #tpu.memory_space<smem>>, %arg18: memref<1x1xf32, #tpu.memory_space<smem>>, %arg19: memref<1x1xf32, #tpu.memory_space<smem>>, %arg20: memref<1x1xf32, #tpu.memory_space<smem>>, %arg21: memref<1x1xf32, #tpu.memory_space<smem>>, %arg22: memref<1x1xf32, #tpu.memory_space<smem>>, %arg23: memref<1x1xf32, #tpu.memory_space<smem>>) attributes {dimension_semantics = [#tpu.dimension_semantics<arbitrary>], iteration_bounds = array<i64: 1>, scalar_prefetch = 0 : i64, scratch_operands = 0 : i64, tpu.core_type = #tpu.core_type<tc>, window_params = [{pipeline_mode = #tpu.pipeline_mode<synchronous>, transform_indices = @transform_0, window_bounds = array<i64: 2, 6>}, {pipeline_mode = #tpu.pipeline_mode<synchronous>, transform_indices = @transform_1, window_bounds = array<i64: 2, 6>}, {pipeline_mode = #tpu.pipeline_mode<synchronous>, transform_indices = @transform_2, window_bounds = array<i64: 2, 1>}, {pipeline_mode = #tpu.pipeline_mode<synchronous>, transform_indices = @transform_3, window_bounds = array<i64: 2, 1>}, {pipeline_mode = #tpu.pipeline_mode<synchronous>, transform_indices = @transform_4, window_bounds = array<i64: 2, 3>}, {pipeline_mode = #tpu.pipeline_mode<synchronous>, transform_indices = @transform_5, window_bounds = array<i64: 2, 3>}, {pipeline_mode = #tpu.pipeline_mode<synchronous>, transform_indices = @transform_6, window_bounds = array<i64: 2, 3>}, {pipeline_mode = #tpu.pipeline_mode<synchronous>, transform_indices = @transform_7, window_bounds = array<i64: 2, 3>}, {pipeline_mode = #tpu.pipeline_mode<synchronous>, transform_indices = @transform_8, window_bounds = array<i64: 2, 3>}, {pipeline_mode = #tpu.pipeline_mode<synchronous>, transform_indices = @transform_9, window_bounds = array<i64: 2, 3>}, {pipeline_mode = #tpu.pipeline_mode<synchronous>, transform_indices = @transform_10, window_bounds = array<i64: 2, 2>}, {pipeline_mode = #tpu.pipeline_mode<synchronous>, transform_indices = @transform_11, window_bounds = array<i64: 2, 2>}, {pipeline_mode = #tpu.pipeline_mode<synchronous>, transform_indices = @transform_12, window_bounds = array<i64: 2, 12>}, {pipeline_mode = #tpu.pipeline_mode<synchronous>, transform_indices = @transform_13, window_bounds = array<i64: 2, 12>}, {transform_indices = @transform_14, window_bounds = array<i64: 1, 1>}, {transform_indices = @transform_15, window_bounds = array<i64: 1, 1>}, {transform_indices = @transform_16, window_bounds = array<i64: 1, 1>}, {transform_indices = @transform_17, window_bounds = array<i64: 1, 1>}, {transform_indices = @transform_18, window_bounds = array<i64: 1, 1>}, {transform_indices = @transform_19, window_bounds = array<i64: 1, 1>}, {transform_indices = @transform_20, window_bounds = array<i64: 1, 1>}, {transform_indices = @transform_21, window_bounds = array<i64: 1, 1>}, {transform_indices = @transform_22, window_bounds = array<i64: 1, 1>}]} {
    %c0 = arith.constant 0 : index
    %c0_0 = arith.constant 0 : index
    %0 = vector.load %arg1[%c0, %c0_0] : memref<2x6xf32, #tpu.memory_space<vmem>>, vector<2x6xf32>
    %c0_1 = arith.constant 0 : index
    %c0_2 = arith.constant 0 : index
    %1 = vector.load %arg2[%c0_1, %c0_2] : memref<2x6xf32, #tpu.memory_space<vmem>>, vector<2x6xf32>
    %2 = arith.subf %0, %1 : vector<2x6xf32>
    %3 = arith.mulf %2, %2 : vector<2x6xf32>
    %4 = vector.shape_cast %3 : vector<2x6xf32> to vector<1x2x6xf32>
    %cst = arith.constant dense<0.000000e+00> : vector<1xf32>
    %5 = vector.multi_reduction <add>, %4, %cst [1, 2] : vector<1x2x6xf32> to vector<1xf32>
    %6 = vector.shape_cast %5 : vector<1xf32> to vector<1x1x1xf32>
    %7 = vector.extract %6[0, 0, 0] : f32 from vector<1x1x1xf32>
    %cst_3 = arith.constant 1.200000e+01 : f32
    %8 = arith.divf %7, %cst_3 : f32
    %c0_4 = arith.constant 0 : index
    %c0_5 = arith.constant 0 : index
    %9 = memref.load %arg15[%c0_4, %c0_5] : memref<1x1xf32, #tpu.memory_space<smem>>
    memref.store %8, %arg15[%c0_4, %c0_5] : memref<1x1xf32, #tpu.memory_space<smem>>
    %c0_6 = arith.constant 0 : index
    %c0_7 = arith.constant 0 : index
    %10 = vector.load %arg3[%c0_6, %c0_7] : memref<2x1xf32, #tpu.memory_space<vmem>>, vector<2x1xf32>
    %c0_8 = arith.constant 0 : index
    %c0_9 = arith.constant 0 : index
    %11 = vector.load %arg4[%c0_8, %c0_9] : memref<2x1xf32, #tpu.memory_space<vmem>>, vector<2x1xf32>
    %12 = arith.subf %10, %11 : vector<2x1xf32>
    %13 = math.absf %12 : vector<2x1xf32>
    %14 = vector.shape_cast %13 : vector<2x1xf32> to vector<1x2x1xf32>
    %cst_10 = arith.constant dense<0.000000e+00> : vector<1xf32>
    %15 = vector.multi_reduction <add>, %14, %cst_10 [1, 2] : vector<1x2x1xf32> to vector<1xf32>
    %16 = vector.shape_cast %15 : vector<1xf32> to vector<1x1x1xf32>
    %17 = vector.extract %16[0, 0, 0] : f32 from vector<1x1x1xf32>
    %cst_11 = arith.constant 2.000000e+00 : f32
    %18 = arith.divf %17, %cst_11 : f32
    %c0_12 = arith.constant 0 : index
    %c0_13 = arith.constant 0 : index
    %19 = memref.load %arg16[%c0_12, %c0_13] : memref<1x1xf32, #tpu.memory_space<smem>>
    memref.store %18, %arg16[%c0_12, %c0_13] : memref<1x1xf32, #tpu.memory_space<smem>>
    %c0_14 = arith.constant 0 : index
    %c0_15 = arith.constant 0 : index
    %20 = vector.load %arg5[%c0_14, %c0_15] : memref<2x3xf32, #tpu.memory_space<vmem>>, vector<2x3xf32>
    %c0_16 = arith.constant 0 : index
    %c0_17 = arith.constant 0 : index
    %21 = vector.load %arg6[%c0_16, %c0_17] : memref<2x3xf32, #tpu.memory_space<vmem>>, vector<2x3xf32>
    %22 = arith.subf %20, %21 : vector<2x3xf32>
    %23 = math.absf %22 : vector<2x3xf32>
    %cst_18 = arith.constant 1.000000e+00 : f32
    %24 = vector.broadcast %cst_18 : f32 to vector<2x3xf32>
    %25 = arith.cmpf olt, %23, %24 : vector<2x3xf32>
    %cst_19 = arith.constant 5.000000e-01 : f32
    %26 = vector.broadcast %cst_19 : f32 to vector<2x3xf32>
    %27 = arith.mulf %26, %22 : vector<2x3xf32>
    %28 = arith.mulf %27, %22 : vector<2x3xf32>
    %cst_20 = arith.constant 5.000000e-01 : f32
    %29 = vector.broadcast %cst_20 : f32 to vector<2x3xf32>
    %30 = arith.subf %23, %29 : vector<2x3xf32>
    %31 = arith.select %25, %28, %30 : vector<2x3xi1>, vector<2x3xf32>
    %32 = vector.shape_cast %31 : vector<2x3xf32> to vector<1x2x3xf32>
    %cst_21 = arith.constant dense<0.000000e+00> : vector<1xf32>
    %33 = vector.multi_reduction <add>, %32, %cst_21 [1, 2] : vector<1x2x3xf32> to vector<1xf32>
    %34 = vector.shape_cast %33 : vector<1xf32> to vector<1x1x1xf32>
    %35 = vector.extract %34[0, 0, 0] : f32 from vector<1x1x1xf32>
    %cst_22 = arith.constant 6.000000e+00 : f32
    %36 = arith.divf %35, %cst_22 : f32
    %c0_23 = arith.constant 0 : index
    %c0_24 = arith.constant 0 : index
    %37 = memref.load %arg17[%c0_23, %c0_24] : memref<1x1xf32, #tpu.memory_space<smem>>
    memref.store %36, %arg17[%c0_23, %c0_24] : memref<1x1xf32, #tpu.memory_space<smem>>
    %c0_25 = arith.constant 0 : index
    %c0_26 = arith.constant 0 : index
    %38 = vector.load %arg7[%c0_25, %c0_26] : memref<2x3xf32, #tpu.memory_space<vmem>>, vector<2x3xf32>
    %c0_27 = arith.constant 0 : index
    %c0_28 = arith.constant 0 : index
    %39 = vector.load %arg8[%c0_27, %c0_28] : memref<2x3xf32, #tpu.memory_space<vmem>>, vector<2x3xf32>
    %40 = arith.subf %38, %39 : vector<2x3xf32>
    %41 = arith.mulf %40, %40 : vector<2x3xf32>
    %42 = vector.shape_cast %41 : vector<2x3xf32> to vector<1x2x3xf32>
    %cst_29 = arith.constant dense<0.000000e+00> : vector<1xf32>
    %43 = vector.multi_reduction <add>, %42, %cst_29 [1, 2] : vector<1x2x3xf32> to vector<1xf32>
    %44 = vector.shape_cast %43 : vector<1xf32> to vector<1x1x1xf32>
    %45 = vector.extract %44[0, 0, 0] : f32 from vector<1x1x1xf32>
    %cst_30 = arith.constant 6.000000e+00 : f32
    %46 = arith.divf %45, %cst_30 : f32
    %c0_31 = arith.constant 0 : index
    %c0_32 = arith.constant 0 : index
    %47 = memref.load %arg18[%c0_31, %c0_32] : memref<1x1xf32, #tpu.memory_space<smem>>
    memref.store %46, %arg18[%c0_31, %c0_32] : memref<1x1xf32, #tpu.memory_space<smem>>
    %c0_33 = arith.constant 0 : index
    %c0_34 = arith.constant 0 : index
    %48 = vector.load %arg9[%c0_33, %c0_34] : memref<2x3xf32, #tpu.memory_space<vmem>>, vector<2x3xf32>
    %c0_35 = arith.constant 0 : index
    %c0_36 = arith.constant 0 : index
    %49 = vector.load %arg10[%c0_35, %c0_36] : memref<2x3xf32, #tpu.memory_space<vmem>>, vector<2x3xf32>
    %50 = arith.subf %48, %49 : vector<2x3xf32>
    %51 = arith.mulf %50, %50 : vector<2x3xf32>
    %52 = vector.shape_cast %51 : vector<2x3xf32> to vector<1x2x3xf32>
    %cst_37 = arith.constant dense<0.000000e+00> : vector<1xf32>
    %53 = vector.multi_reduction <add>, %52, %cst_37 [1, 2] : vector<1x2x3xf32> to vector<1xf32>
    %54 = vector.shape_cast %53 : vector<1xf32> to vector<1x1x1xf32>
    %55 = vector.extract %54[0, 0, 0] : f32 from vector<1x1x1xf32>
    %cst_38 = arith.constant 6.000000e+00 : f32
    %56 = arith.divf %55, %cst_38 : f32
    %c0_39 = arith.constant 0 : index
    %c0_40 = arith.constant 0 : index
    %57 = memref.load %arg19[%c0_39, %c0_40] : memref<1x1xf32, #tpu.memory_space<smem>>
    memref.store %56, %arg19[%c0_39, %c0_40] : memref<1x1xf32, #tpu.memory_space<smem>>
    %c0_41 = arith.constant 0 : index
    %c0_42 = arith.constant 0 : index
    %58 = vector.load %arg11[%c0_41, %c0_42] : memref<2x2xf32, #tpu.memory_space<vmem>>, vector<2x2xf32>
    %c0_43 = arith.constant 0 : index
    %c0_44 = arith.constant 0 : index
    %59 = vector.load %arg12[%c0_43, %c0_44] : memref<2x2xf32, #tpu.memory_space<vmem>>, vector<2x2xf32>
    %60 = arith.subf %58, %59 : vector<2x2xf32>
    %61 = math.absf %60 : vector<2x2xf32>
    %62 = vector.shape_cast %61 : vector<2x2xf32> to vector<1x2x2xf32>
    %cst_45 = arith.constant dense<0.000000e+00> : vector<1xf32>
    %63 = vector.multi_reduction <add>, %62, %cst_45 [1, 2] : vector<1x2x2xf32> to vector<1xf32>
    %64 = vector.shape_cast %63 : vector<1xf32> to vector<1x1x1xf32>
    %65 = vector.extract %64[0, 0, 0] : f32 from vector<1x1x1xf32>
    %cst_46 = arith.constant 4.000000e+00 : f32
    %66 = arith.divf %65, %cst_46 : f32
    %c0_47 = arith.constant 0 : index
    %c0_48 = arith.constant 0 : index
    %67 = memref.load %arg20[%c0_47, %c0_48] : memref<1x1xf32, #tpu.memory_space<smem>>
    memref.store %66, %arg20[%c0_47, %c0_48] : memref<1x1xf32, #tpu.memory_space<smem>>
    %c0_49 = arith.constant 0 : index
    %c0_50 = arith.constant 0 : index
    %68 = vector.load %arg13[%c0_49, %c0_50] : memref<2x12xf32, #tpu.memory_space<vmem>>, vector<2x12xf32>
    %c0_51 = arith.constant 0 : index
    %c0_52 = arith.constant 0 : index
    %69 = vector.load %arg14[%c0_51, %c0_52] : memref<2x12xf32, #tpu.memory_space<vmem>>, vector<2x12xf32>
    %70 = arith.subf %68, %69 : vector<2x12xf32>
    %71 = arith.mulf %70, %70 : vector<2x12xf32>
    %72 = vector.shape_cast %71 : vector<2x12xf32> to vector<1x2x12xf32>
    %cst_53 = arith.constant dense<0.000000e+00> : vector<1xf32>
    %73 = vector.multi_reduction <add>, %72, %cst_53 [1, 2] : vector<1x2x12xf32> to vector<1xf32>
    %74 = vector.shape_cast %73 : vector<1xf32> to vector<1x1x1xf32>
    %75 = vector.extract %74[0, 0, 0] : f32 from vector<1x1x1xf32>
    %cst_54 = arith.constant 2.400000e+01 : f32
    %76 = arith.divf %75, %cst_54 : f32
    %c0_55 = arith.constant 0 : index
    %c0_56 = arith.constant 0 : index
    %77 = memref.load %arg21[%c0_55, %c0_56] : memref<1x1xf32, #tpu.memory_space<smem>>
    memref.store %76, %arg21[%c0_55, %c0_56] : memref<1x1xf32, #tpu.memory_space<smem>>
    %78 = vector.extract_strided_slice %0 {offsets = [0, 0], sizes = [2, 3], strides = [1, 1]} : vector<2x6xf32> to vector<2x3xf32>
    %79 = vector.extract_strided_slice %0 {offsets = [0, 3], sizes = [2, 3], strides = [1, 1]} : vector<2x6xf32> to vector<2x3xf32>
    %80 = arith.mulf %78, %78 : vector<2x3xf32>
    %cst_57 = arith.constant dense<0.000000e+00> : vector<2xf32>
    %81 = vector.multi_reduction <add>, %80, %cst_57 [1] : vector<2x3xf32> to vector<2xf32>
    %82 = vector.shape_cast %81 : vector<2xf32> to vector<2x1xf32>
    %83 = math.sqrt %82 : vector<2x1xf32>
    %cst_58 = arith.constant 9.99999993E-9 : f32
    %84 = vector.broadcast %cst_58 : f32 to vector<2x1xf32>
    %85 = arith.addf %83, %84 : vector<2x1xf32>
    %86 = vector.broadcast %85 : vector<2x1xf32> to vector<2x3xf32>
    %87 = arith.divf %78, %86 : vector<2x3xf32>
    %88 = arith.mulf %87, %79 : vector<2x3xf32>
    %cst_59 = arith.constant dense<0.000000e+00> : vector<2xf32>
    %89 = vector.multi_reduction <add>, %88, %cst_59 [1] : vector<2x3xf32> to vector<2xf32>
    %90 = vector.shape_cast %89 : vector<2xf32> to vector<2x1xf32>
    %91 = vector.broadcast %90 : vector<2x1xf32> to vector<2x3xf32>
    %92 = arith.mulf %91, %87 : vector<2x3xf32>
    %93 = arith.subf %79, %92 : vector<2x3xf32>
    %94 = arith.mulf %93, %93 : vector<2x3xf32>
    %cst_60 = arith.constant dense<0.000000e+00> : vector<2xf32>
    %95 = vector.multi_reduction <add>, %94, %cst_60 [1] : vector<2x3xf32> to vector<2xf32>
    %96 = vector.shape_cast %95 : vector<2xf32> to vector<2x1xf32>
    %97 = math.sqrt %96 : vector<2x1xf32>
    %cst_61 = arith.constant 9.99999993E-9 : f32
    %98 = vector.broadcast %cst_61 : f32 to vector<2x1xf32>
    %99 = arith.addf %97, %98 : vector<2x1xf32>
    %100 = vector.broadcast %99 : vector<2x1xf32> to vector<2x3xf32>
    %101 = arith.divf %93, %100 : vector<2x3xf32>
    %102 = vector.extract_strided_slice %87 {offsets = [0, 1], sizes = [2, 1], strides = [1, 1]} : vector<2x3xf32> to vector<2x1xf32>
    %103 = vector.extract_strided_slice %101 {offsets = [0, 2], sizes = [2, 1], strides = [1, 1]} : vector<2x3xf32> to vector<2x1xf32>
    %104 = arith.mulf %102, %103 : vector<2x1xf32>
    %105 = vector.extract_strided_slice %87 {offsets = [0, 2], sizes = [2, 1], strides = [1, 1]} : vector<2x3xf32> to vector<2x1xf32>
    %106 = vector.extract_strided_slice %101 {offsets = [0, 1], sizes = [2, 1], strides = [1, 1]} : vector<2x3xf32> to vector<2x1xf32>
    %107 = arith.mulf %105, %106 : vector<2x1xf32>
    %108 = arith.subf %104, %107 : vector<2x1xf32>
    %109 = vector.extract_strided_slice %87 {offsets = [0, 2], sizes = [2, 1], strides = [1, 1]} : vector<2x3xf32> to vector<2x1xf32>
    %110 = vector.extract_strided_slice %101 {offsets = [0, 0], sizes = [2, 1], strides = [1, 1]} : vector<2x3xf32> to vector<2x1xf32>
    %111 = arith.mulf %109, %110 : vector<2x1xf32>
    %112 = vector.extract_strided_slice %87 {offsets = [0, 0], sizes = [2, 1], strides = [1, 1]} : vector<2x3xf32> to vector<2x1xf32>
    %113 = vector.extract_strided_slice %101 {offsets = [0, 2], sizes = [2, 1], strides = [1, 1]} : vector<2x3xf32> to vector<2x1xf32>
    %114 = arith.mulf %112, %113 : vector<2x1xf32>
    %115 = arith.subf %111, %114 : vector<2x1xf32>
    %116 = vector.extract_strided_slice %87 {offsets = [0, 0], sizes = [2, 1], strides = [1, 1]} : vector<2x3xf32> to vector<2x1xf32>
    %117 = vector.extract_strided_slice %101 {offsets = [0, 1], sizes = [2, 1], strides = [1, 1]} : vector<2x3xf32> to vector<2x1xf32>
    %118 = arith.mulf %116, %117 : vector<2x1xf32>
    %119 = vector.extract_strided_slice %87 {offsets = [0, 1], sizes = [2, 1], strides = [1, 1]} : vector<2x3xf32> to vector<2x1xf32>
    %120 = vector.extract_strided_slice %101 {offsets = [0, 0], sizes = [2, 1], strides = [1, 1]} : vector<2x3xf32> to vector<2x1xf32>
    %121 = arith.mulf %119, %120 : vector<2x1xf32>
    %122 = arith.subf %118, %121 : vector<2x1xf32>
    %123 = tpu.concatenate %108, %115, %122 in 1 : vector<2x1xf32>, vector<2x1xf32>, vector<2x1xf32> -> vector<2x3xf32>
    %124 = vector.extract_strided_slice %68 {offsets = [0, 0], sizes = [2, 3], strides = [1, 1]} : vector<2x12xf32> to vector<2x3xf32>
    %125 = vector.extract_strided_slice %68 {offsets = [0, 3], sizes = [2, 3], strides = [1, 1]} : vector<2x12xf32> to vector<2x3xf32>
    %126 = vector.extract_strided_slice %68 {offsets = [0, 6], sizes = [2, 3], strides = [1, 1]} : vector<2x12xf32> to vector<2x3xf32>
    %127 = vector.extract_strided_slice %68 {offsets = [0, 9], sizes = [2, 3], strides = [1, 1]} : vector<2x12xf32> to vector<2x3xf32>
    %128 = vector.extract_strided_slice %58 {offsets = [0, 0], sizes = [2, 1], strides = [1, 1]} : vector<2x2xf32> to vector<2x1xf32>
    %129 = vector.broadcast %128 : vector<2x1xf32> to vector<2x3xf32>
    %130 = arith.mulf %123, %129 : vector<2x3xf32>
    %131 = arith.addf %124, %130 : vector<2x3xf32>
    %132 = vector.extract_strided_slice %58 {offsets = [0, 1], sizes = [2, 1], strides = [1, 1]} : vector<2x2xf32> to vector<2x1xf32>
    %133 = vector.broadcast %132 : vector<2x1xf32> to vector<2x3xf32>
    %134 = arith.mulf %101, %133 : vector<2x3xf32>
    %135 = arith.addf %131, %134 : vector<2x3xf32>
    %136 = arith.mulf %101, %101 : vector<2x3xf32>
    %cst_62 = arith.constant dense<0.000000e+00> : vector<2xf32>
    %137 = vector.multi_reduction <add>, %136, %cst_62 [1] : vector<2x3xf32> to vector<2xf32>
    %138 = vector.shape_cast %137 : vector<2xf32> to vector<2x1xf32>
    %139 = math.sqrt %138 : vector<2x1xf32>
    %cst_63 = arith.constant 9.99999997E-7 : f32
    %140 = vector.broadcast %cst_63 : f32 to vector<2x1xf32>
    %141 = arith.addf %139, %140 : vector<2x1xf32>
    %142 = vector.broadcast %141 : vector<2x1xf32> to vector<2x3xf32>
    %143 = arith.divf %101, %142 : vector<2x3xf32>
    %144 = arith.subf %125, %135 : vector<2x3xf32>
    %145 = arith.subf %126, %125 : vector<2x3xf32>
    %146 = arith.subf %127, %126 : vector<2x3xf32>
    %147 = arith.subf %126, %135 : vector<2x3xf32>
    %148 = arith.subf %127, %135 : vector<2x3xf32>
    %149 = arith.mulf %144, %143 : vector<2x3xf32>
    %cst_64 = arith.constant dense<0.000000e+00> : vector<2xf32>
    %150 = vector.multi_reduction <add>, %149, %cst_64 [1] : vector<2x3xf32> to vector<2xf32>
    %151 = vector.shape_cast %150 : vector<2xf32> to vector<2x1xf32>
    %152 = arith.mulf %151, %151 : vector<2x1xf32>
    %153 = arith.mulf %145, %143 : vector<2x3xf32>
    %cst_65 = arith.constant dense<0.000000e+00> : vector<2xf32>
    %154 = vector.multi_reduction <add>, %153, %cst_65 [1] : vector<2x3xf32> to vector<2xf32>
    %155 = vector.shape_cast %154 : vector<2xf32> to vector<2x1xf32>
    %156 = arith.mulf %155, %155 : vector<2x1xf32>
    %157 = arith.mulf %146, %143 : vector<2x3xf32>
    %cst_66 = arith.constant dense<0.000000e+00> : vector<2xf32>
    %158 = vector.multi_reduction <add>, %157, %cst_66 [1] : vector<2x3xf32> to vector<2xf32>
    %159 = vector.shape_cast %158 : vector<2xf32> to vector<2x1xf32>
    %160 = arith.mulf %159, %159 : vector<2x1xf32>
    %161 = arith.mulf %147, %143 : vector<2x3xf32>
    %cst_67 = arith.constant dense<0.000000e+00> : vector<2xf32>
    %162 = vector.multi_reduction <add>, %161, %cst_67 [1] : vector<2x3xf32> to vector<2xf32>
    %163 = vector.shape_cast %162 : vector<2xf32> to vector<2x1xf32>
    %164 = arith.mulf %163, %163 : vector<2x1xf32>
    %165 = arith.mulf %148, %143 : vector<2x3xf32>
    %cst_68 = arith.constant dense<0.000000e+00> : vector<2xf32>
    %166 = vector.multi_reduction <add>, %165, %cst_68 [1] : vector<2x3xf32> to vector<2xf32>
    %167 = vector.shape_cast %166 : vector<2xf32> to vector<2x1xf32>
    %168 = arith.mulf %167, %167 : vector<2x1xf32>
    %169 = tpu.concatenate %152, %156, %160, %164, %168 in 1 : vector<2x1xf32>, vector<2x1xf32>, vector<2x1xf32>, vector<2x1xf32>, vector<2x1xf32> -> vector<2x5xf32>
    %170 = vector.shape_cast %169 : vector<2x5xf32> to vector<1x2x5xf32>
    %cst_69 = arith.constant dense<0.000000e+00> : vector<1xf32>
    %171 = vector.multi_reduction <add>, %170, %cst_69 [1, 2] : vector<1x2x5xf32> to vector<1xf32>
    %172 = vector.shape_cast %171 : vector<1xf32> to vector<1x1x1xf32>
    %173 = vector.extract %172[0, 0, 0] : f32 from vector<1x1x1xf32>
    %cst_70 = arith.constant 1.000000e+01 : f32
    %174 = arith.divf %173, %cst_70 : f32
    %175 = arith.subf %125, %135 : vector<2x3xf32>
    %176 = arith.subf %126, %135 : vector<2x3xf32>
    %177 = vector.extract_strided_slice %175 {offsets = [0, 1], sizes = [2, 1], strides = [1, 1]} : vector<2x3xf32> to vector<2x1xf32>
    %178 = vector.extract_strided_slice %176 {offsets = [0, 2], sizes = [2, 1], strides = [1, 1]} : vector<2x3xf32> to vector<2x1xf32>
    %179 = arith.mulf %177, %178 : vector<2x1xf32>
    %180 = vector.extract_strided_slice %175 {offsets = [0, 2], sizes = [2, 1], strides = [1, 1]} : vector<2x3xf32> to vector<2x1xf32>
    %181 = vector.extract_strided_slice %176 {offsets = [0, 1], sizes = [2, 1], strides = [1, 1]} : vector<2x3xf32> to vector<2x1xf32>
    %182 = arith.mulf %180, %181 : vector<2x1xf32>
    %183 = arith.subf %179, %182 : vector<2x1xf32>
    %184 = vector.extract_strided_slice %175 {offsets = [0, 2], sizes = [2, 1], strides = [1, 1]} : vector<2x3xf32> to vector<2x1xf32>
    %185 = vector.extract_strided_slice %176 {offsets = [0, 0], sizes = [2, 1], strides = [1, 1]} : vector<2x3xf32> to vector<2x1xf32>
    %186 = arith.mulf %184, %185 : vector<2x1xf32>
    %187 = vector.extract_strided_slice %175 {offsets = [0, 0], sizes = [2, 1], strides = [1, 1]} : vector<2x3xf32> to vector<2x1xf32>
    %188 = vector.extract_strided_slice %176 {offsets = [0, 2], sizes = [2, 1], strides = [1, 1]} : vector<2x3xf32> to vector<2x1xf32>
    %189 = arith.mulf %187, %188 : vector<2x1xf32>
    %190 = arith.subf %186, %189 : vector<2x1xf32>
    %191 = vector.extract_strided_slice %175 {offsets = [0, 0], sizes = [2, 1], strides = [1, 1]} : vector<2x3xf32> to vector<2x1xf32>
    %192 = vector.extract_strided_slice %176 {offsets = [0, 1], sizes = [2, 1], strides = [1, 1]} : vector<2x3xf32> to vector<2x1xf32>
    %193 = arith.mulf %191, %192 : vector<2x1xf32>
    %194 = vector.extract_strided_slice %175 {offsets = [0, 1], sizes = [2, 1], strides = [1, 1]} : vector<2x3xf32> to vector<2x1xf32>
    %195 = vector.extract_strided_slice %176 {offsets = [0, 0], sizes = [2, 1], strides = [1, 1]} : vector<2x3xf32> to vector<2x1xf32>
    %196 = arith.mulf %194, %195 : vector<2x1xf32>
    %197 = arith.subf %193, %196 : vector<2x1xf32>
    %198 = tpu.concatenate %183, %190, %197 in 1 : vector<2x1xf32>, vector<2x1xf32>, vector<2x1xf32> -> vector<2x3xf32>
    %199 = arith.mulf %198, %198 : vector<2x3xf32>
    %cst_71 = arith.constant dense<0.000000e+00> : vector<2xf32>
    %200 = vector.multi_reduction <add>, %199, %cst_71 [1] : vector<2x3xf32> to vector<2xf32>
    %201 = vector.shape_cast %200 : vector<2xf32> to vector<2x1xf32>
    %202 = math.sqrt %201 : vector<2x1xf32>
    %cst_72 = arith.constant 9.99999997E-7 : f32
    %203 = vector.broadcast %cst_72 : f32 to vector<2x1xf32>
    %204 = arith.addf %202, %203 : vector<2x1xf32>
    %205 = vector.broadcast %204 : vector<2x1xf32> to vector<2x3xf32>
    %206 = arith.divf %198, %205 : vector<2x3xf32>
    %207 = arith.subf %127, %135 : vector<2x3xf32>
    %208 = arith.mulf %206, %207 : vector<2x3xf32>
    %cst_73 = arith.constant dense<0.000000e+00> : vector<2xf32>
    %209 = vector.multi_reduction <add>, %208, %cst_73 [1] : vector<2x3xf32> to vector<2xf32>
    %210 = vector.shape_cast %209 : vector<2xf32> to vector<2x1xf32>
    %211 = arith.mulf %210, %210 : vector<2x1xf32>
    %212 = arith.subf %126, %125 : vector<2x3xf32>
    %213 = arith.subf %127, %125 : vector<2x3xf32>
    %214 = vector.extract_strided_slice %212 {offsets = [0, 1], sizes = [2, 1], strides = [1, 1]} : vector<2x3xf32> to vector<2x1xf32>
    %215 = vector.extract_strided_slice %213 {offsets = [0, 2], sizes = [2, 1], strides = [1, 1]} : vector<2x3xf32> to vector<2x1xf32>
    %216 = arith.mulf %214, %215 : vector<2x1xf32>
    %217 = vector.extract_strided_slice %212 {offsets = [0, 2], sizes = [2, 1], strides = [1, 1]} : vector<2x3xf32> to vector<2x1xf32>
    %218 = vector.extract_strided_slice %213 {offsets = [0, 1], sizes = [2, 1], strides = [1, 1]} : vector<2x3xf32> to vector<2x1xf32>
    %219 = arith.mulf %217, %218 : vector<2x1xf32>
    %220 = arith.subf %216, %219 : vector<2x1xf32>
    %221 = vector.extract_strided_slice %212 {offsets = [0, 2], sizes = [2, 1], strides = [1, 1]} : vector<2x3xf32> to vector<2x1xf32>
    %222 = vector.extract_strided_slice %213 {offsets = [0, 0], sizes = [2, 1], strides = [1, 1]} : vector<2x3xf32> to vector<2x1xf32>
    %223 = arith.mulf %221, %222 : vector<2x1xf32>
    %224 = vector.extract_strided_slice %212 {offsets = [0, 0], sizes = [2, 1], strides = [1, 1]} : vector<2x3xf32> to vector<2x1xf32>
    %225 = vector.extract_strided_slice %213 {offsets = [0, 2], sizes = [2, 1], strides = [1, 1]} : vector<2x3xf32> to vector<2x1xf32>
    %226 = arith.mulf %224, %225 : vector<2x1xf32>
    %227 = arith.subf %223, %226 : vector<2x1xf32>
    %228 = vector.extract_strided_slice %212 {offsets = [0, 0], sizes = [2, 1], strides = [1, 1]} : vector<2x3xf32> to vector<2x1xf32>
    %229 = vector.extract_strided_slice %213 {offsets = [0, 1], sizes = [2, 1], strides = [1, 1]} : vector<2x3xf32> to vector<2x1xf32>
    %230 = arith.mulf %228, %229 : vector<2x1xf32>
    %231 = vector.extract_strided_slice %212 {offsets = [0, 1], sizes = [2, 1], strides = [1, 1]} : vector<2x3xf32> to vector<2x1xf32>
    %232 = vector.extract_strided_slice %213 {offsets = [0, 0], sizes = [2, 1], strides = [1, 1]} : vector<2x3xf32> to vector<2x1xf32>
    %233 = arith.mulf %231, %232 : vector<2x1xf32>
    %234 = arith.subf %230, %233 : vector<2x1xf32>
    %235 = tpu.concatenate %220, %227, %234 in 1 : vector<2x1xf32>, vector<2x1xf32>, vector<2x1xf32> -> vector<2x3xf32>
    %236 = arith.mulf %235, %235 : vector<2x3xf32>
    %cst_74 = arith.constant dense<0.000000e+00> : vector<2xf32>
    %237 = vector.multi_reduction <add>, %236, %cst_74 [1] : vector<2x3xf32> to vector<2xf32>
    %238 = vector.shape_cast %237 : vector<2xf32> to vector<2x1xf32>
    %239 = math.sqrt %238 : vector<2x1xf32>
    %cst_75 = arith.constant 9.99999997E-7 : f32
    %240 = vector.broadcast %cst_75 : f32 to vector<2x1xf32>
    %241 = arith.addf %239, %240 : vector<2x1xf32>
    %242 = vector.broadcast %241 : vector<2x1xf32> to vector<2x3xf32>
    %243 = arith.divf %235, %242 : vector<2x3xf32>
    %244 = arith.subf %135, %125 : vector<2x3xf32>
    %245 = arith.mulf %243, %244 : vector<2x3xf32>
    %cst_76 = arith.constant dense<0.000000e+00> : vector<2xf32>
    %246 = vector.multi_reduction <add>, %245, %cst_76 [1] : vector<2x3xf32> to vector<2xf32>
    %247 = vector.shape_cast %246 : vector<2xf32> to vector<2x1xf32>
    %248 = arith.mulf %247, %247 : vector<2x1xf32>
    %249 = arith.addf %211, %248 : vector<2x1xf32>
    %250 = arith.subf %127, %126 : vector<2x3xf32>
    %251 = arith.subf %135, %126 : vector<2x3xf32>
    %252 = vector.extract_strided_slice %250 {offsets = [0, 1], sizes = [2, 1], strides = [1, 1]} : vector<2x3xf32> to vector<2x1xf32>
    %253 = vector.extract_strided_slice %251 {offsets = [0, 2], sizes = [2, 1], strides = [1, 1]} : vector<2x3xf32> to vector<2x1xf32>
    %254 = arith.mulf %252, %253 : vector<2x1xf32>
    %255 = vector.extract_strided_slice %250 {offsets = [0, 2], sizes = [2, 1], strides = [1, 1]} : vector<2x3xf32> to vector<2x1xf32>
    %256 = vector.extract_strided_slice %251 {offsets = [0, 1], sizes = [2, 1], strides = [1, 1]} : vector<2x3xf32> to vector<2x1xf32>
    %257 = arith.mulf %255, %256 : vector<2x1xf32>
    %258 = arith.subf %254, %257 : vector<2x1xf32>
    %259 = vector.extract_strided_slice %250 {offsets = [0, 2], sizes = [2, 1], strides = [1, 1]} : vector<2x3xf32> to vector<2x1xf32>
    %260 = vector.extract_strided_slice %251 {offsets = [0, 0], sizes = [2, 1], strides = [1, 1]} : vector<2x3xf32> to vector<2x1xf32>
    %261 = arith.mulf %259, %260 : vector<2x1xf32>
    %262 = vector.extract_strided_slice %250 {offsets = [0, 0], sizes = [2, 1], strides = [1, 1]} : vector<2x3xf32> to vector<2x1xf32>
    %263 = vector.extract_strided_slice %251 {offsets = [0, 2], sizes = [2, 1], strides = [1, 1]} : vector<2x3xf32> to vector<2x1xf32>
    %264 = arith.mulf %262, %263 : vector<2x1xf32>
    %265 = arith.subf %261, %264 : vector<2x1xf32>
    %266 = vector.extract_strided_slice %250 {offsets = [0, 0], sizes = [2, 1], strides = [1, 1]} : vector<2x3xf32> to vector<2x1xf32>
    %267 = vector.extract_strided_slice %251 {offsets = [0, 1], sizes = [2, 1], strides = [1, 1]} : vector<2x3xf32> to vector<2x1xf32>
    %268 = arith.mulf %266, %267 : vector<2x1xf32>
    %269 = vector.extract_strided_slice %250 {offsets = [0, 1], sizes = [2, 1], strides = [1, 1]} : vector<2x3xf32> to vector<2x1xf32>
    %270 = vector.extract_strided_slice %251 {offsets = [0, 0], sizes = [2, 1], strides = [1, 1]} : vector<2x3xf32> to vector<2x1xf32>
    %271 = arith.mulf %269, %270 : vector<2x1xf32>
    %272 = arith.subf %268, %271 : vector<2x1xf32>
    %273 = tpu.concatenate %258, %265, %272 in 1 : vector<2x1xf32>, vector<2x1xf32>, vector<2x1xf32> -> vector<2x3xf32>
    %274 = arith.mulf %273, %273 : vector<2x3xf32>
    %cst_77 = arith.constant dense<0.000000e+00> : vector<2xf32>
    %275 = vector.multi_reduction <add>, %274, %cst_77 [1] : vector<2x3xf32> to vector<2xf32>
    %276 = vector.shape_cast %275 : vector<2xf32> to vector<2x1xf32>
    %277 = math.sqrt %276 : vector<2x1xf32>
    %cst_78 = arith.constant 9.99999997E-7 : f32
    %278 = vector.broadcast %cst_78 : f32 to vector<2x1xf32>
    %279 = arith.addf %277, %278 : vector<2x1xf32>
    %280 = vector.broadcast %279 : vector<2x1xf32> to vector<2x3xf32>
    %281 = arith.divf %273, %280 : vector<2x3xf32>
    %282 = arith.subf %125, %126 : vector<2x3xf32>
    %283 = arith.mulf %281, %282 : vector<2x3xf32>
    %cst_79 = arith.constant dense<0.000000e+00> : vector<2xf32>
    %284 = vector.multi_reduction <add>, %283, %cst_79 [1] : vector<2x3xf32> to vector<2xf32>
    %285 = vector.shape_cast %284 : vector<2xf32> to vector<2x1xf32>
    %286 = arith.mulf %285, %285 : vector<2x1xf32>
    %287 = arith.addf %249, %286 : vector<2x1xf32>
    %288 = arith.subf %135, %127 : vector<2x3xf32>
    %289 = arith.subf %125, %127 : vector<2x3xf32>
    %290 = vector.extract_strided_slice %288 {offsets = [0, 1], sizes = [2, 1], strides = [1, 1]} : vector<2x3xf32> to vector<2x1xf32>
    %291 = vector.extract_strided_slice %289 {offsets = [0, 2], sizes = [2, 1], strides = [1, 1]} : vector<2x3xf32> to vector<2x1xf32>
    %292 = arith.mulf %290, %291 : vector<2x1xf32>
    %293 = vector.extract_strided_slice %288 {offsets = [0, 2], sizes = [2, 1], strides = [1, 1]} : vector<2x3xf32> to vector<2x1xf32>
    %294 = vector.extract_strided_slice %289 {offsets = [0, 1], sizes = [2, 1], strides = [1, 1]} : vector<2x3xf32> to vector<2x1xf32>
    %295 = arith.mulf %293, %294 : vector<2x1xf32>
    %296 = arith.subf %292, %295 : vector<2x1xf32>
    %297 = vector.extract_strided_slice %288 {offsets = [0, 2], sizes = [2, 1], strides = [1, 1]} : vector<2x3xf32> to vector<2x1xf32>
    %298 = vector.extract_strided_slice %289 {offsets = [0, 0], sizes = [2, 1], strides = [1, 1]} : vector<2x3xf32> to vector<2x1xf32>
    %299 = arith.mulf %297, %298 : vector<2x1xf32>
    %300 = vector.extract_strided_slice %288 {offsets = [0, 0], sizes = [2, 1], strides = [1, 1]} : vector<2x3xf32> to vector<2x1xf32>
    %301 = vector.extract_strided_slice %289 {offsets = [0, 2], sizes = [2, 1], strides = [1, 1]} : vector<2x3xf32> to vector<2x1xf32>
    %302 = arith.mulf %300, %301 : vector<2x1xf32>
    %303 = arith.subf %299, %302 : vector<2x1xf32>
    %304 = vector.extract_strided_slice %288 {offsets = [0, 0], sizes = [2, 1], strides = [1, 1]} : vector<2x3xf32> to vector<2x1xf32>
    %305 = vector.extract_strided_slice %289 {offsets = [0, 1], sizes = [2, 1], strides = [1, 1]} : vector<2x3xf32> to vector<2x1xf32>
    %306 = arith.mulf %304, %305 : vector<2x1xf32>
    %307 = vector.extract_strided_slice %288 {offsets = [0, 1], sizes = [2, 1], strides = [1, 1]} : vector<2x3xf32> to vector<2x1xf32>
    %308 = vector.extract_strided_slice %289 {offsets = [0, 0], sizes = [2, 1], strides = [1, 1]} : vector<2x3xf32> to vector<2x1xf32>
    %309 = arith.mulf %307, %308 : vector<2x1xf32>
    %310 = arith.subf %306, %309 : vector<2x1xf32>
    %311 = tpu.concatenate %296, %303, %310 in 1 : vector<2x1xf32>, vector<2x1xf32>, vector<2x1xf32> -> vector<2x3xf32>
    %312 = arith.mulf %311, %311 : vector<2x3xf32>
    %cst_80 = arith.constant dense<0.000000e+00> : vector<2xf32>
    %313 = vector.multi_reduction <add>, %312, %cst_80 [1] : vector<2x3xf32> to vector<2xf32>
    %314 = vector.shape_cast %313 : vector<2xf32> to vector<2x1xf32>
    %315 = math.sqrt %314 : vector<2x1xf32>
    %cst_81 = arith.constant 9.99999997E-7 : f32
    %316 = vector.broadcast %cst_81 : f32 to vector<2x1xf32>
    %317 = arith.addf %315, %316 : vector<2x1xf32>
    %318 = vector.broadcast %317 : vector<2x1xf32> to vector<2x3xf32>
    %319 = arith.divf %311, %318 : vector<2x3xf32>
    %320 = arith.subf %126, %127 : vector<2x3xf32>
    %321 = arith.mulf %319, %320 : vector<2x3xf32>
    %cst_82 = arith.constant dense<0.000000e+00> : vector<2xf32>
    %322 = vector.multi_reduction <add>, %321, %cst_82 [1] : vector<2x3xf32> to vector<2xf32>
    %323 = vector.shape_cast %322 : vector<2xf32> to vector<2x1xf32>
    %324 = arith.mulf %323, %323 : vector<2x1xf32>
    %325 = arith.addf %287, %324 : vector<2x1xf32>
    %cst_83 = arith.constant 4.000000e+00 : f32
    %326 = vector.broadcast %cst_83 : f32 to vector<2x1xf32>
    %327 = arith.divf %325, %326 : vector<2x1xf32>
    %328 = vector.shape_cast %327 : vector<2x1xf32> to vector<1x2x1xf32>
    %cst_84 = arith.constant dense<0.000000e+00> : vector<1xf32>
    %329 = vector.multi_reduction <add>, %328, %cst_84 [1, 2] : vector<1x2x1xf32> to vector<1xf32>
    %330 = vector.shape_cast %329 : vector<1xf32> to vector<1x1x1xf32>
    %331 = vector.extract %330[0, 0, 0] : f32 from vector<1x1x1xf32>
    %cst_85 = arith.constant 2.000000e+00 : f32
    %332 = arith.divf %331, %cst_85 : f32
    %c0_86 = arith.constant 0 : index
    %c0_87 = arith.constant 0 : index
    %333 = memref.load %arg22[%c0_86, %c0_87] : memref<1x1xf32, #tpu.memory_space<smem>>
    memref.store %174, %arg22[%c0_86, %c0_87] : memref<1x1xf32, #tpu.memory_space<smem>>
    %c0_88 = arith.constant 0 : index
    %c0_89 = arith.constant 0 : index
    %334 = memref.load %arg23[%c0_88, %c0_89] : memref<1x1xf32, #tpu.memory_space<smem>>
    memref.store %332, %arg23[%c0_88, %c0_89] : memref<1x1xf32, #tpu.memory_space<smem>>
    return
  }
  func.func @transform_0(%arg0: i32) -> (i32, i32) {
    %c0_i32 = arith.constant 0 : i32
    %c0_i32_0 = arith.constant 0 : i32
    %c0_i32_1 = arith.constant 0 : i32
    return %c0_i32, %c0_i32_0 : i32, i32
  }
  func.func @transform_1(%arg0: i32) -> (i32, i32) {
    %c0_i32 = arith.constant 0 : i32
    %c0_i32_0 = arith.constant 0 : i32
    %c0_i32_1 = arith.constant 0 : i32
    return %c0_i32, %c0_i32_0 : i32, i32
  }
  func.func @transform_2(%arg0: i32) -> (i32, i32) {
    %c0_i32 = arith.constant 0 : i32
    %c0_i32_0 = arith.constant 0 : i32
    %c0_i32_1 = arith.constant 0 : i32
    return %c0_i32, %c0_i32_0 : i32, i32
  }
  func.func @transform_3(%arg0: i32) -> (i32, i32) {
    %c0_i32 = arith.constant 0 : i32
    %c0_i32_0 = arith.constant 0 : i32
    %c0_i32_1 = arith.constant 0 : i32
    return %c0_i32, %c0_i32_0 : i32, i32
  }
  func.func @transform_4(%arg0: i32) -> (i32, i32) {
    %c0_i32 = arith.constant 0 : i32
    %c0_i32_0 = arith.constant 0 : i32
    %c0_i32_1 = arith.constant 0 : i32
    return %c0_i32, %c0_i32_0 : i32, i32
  }
  func.func @transform_5(%arg0: i32) -> (i32, i32) {
    %c0_i32 = arith.constant 0 : i32
    %c0_i32_0 = arith.constant 0 : i32
    %c0_i32_1 = arith.constant 0 : i32
    return %c0_i32, %c0_i32_0 : i32, i32
  }
  func.func @transform_6(%arg0: i32) -> (i32, i32) {
    %c0_i32 = arith.constant 0 : i32
    %c0_i32_0 = arith.constant 0 : i32
    %c0_i32_1 = arith.constant 0 : i32
    return %c0_i32, %c0_i32_0 : i32, i32
  }
  func.func @transform_7(%arg0: i32) -> (i32, i32) {
    %c0_i32 = arith.constant 0 : i32
    %c0_i32_0 = arith.constant 0 : i32
    %c0_i32_1 = arith.constant 0 : i32
    return %c0_i32, %c0_i32_0 : i32, i32
  }
  func.func @transform_8(%arg0: i32) -> (i32, i32) {
    %c0_i32 = arith.constant 0 : i32
    %c0_i32_0 = arith.constant 0 : i32
    %c0_i32_1 = arith.constant 0 : i32
    return %c0_i32, %c0_i32_0 : i32, i32
  }
  func.func @transform_9(%arg0: i32) -> (i32, i32) {
    %c0_i32 = arith.constant 0 : i32
    %c0_i32_0 = arith.constant 0 : i32
    %c0_i32_1 = arith.constant 0 : i32
    return %c0_i32, %c0_i32_0 : i32, i32
  }
  func.func @transform_10(%arg0: i32) -> (i32, i32) {
    %c0_i32 = arith.constant 0 : i32
    %c0_i32_0 = arith.constant 0 : i32
    %c0_i32_1 = arith.constant 0 : i32
    return %c0_i32, %c0_i32_0 : i32, i32
  }
  func.func @transform_11(%arg0: i32) -> (i32, i32) {
    %c0_i32 = arith.constant 0 : i32
    %c0_i32_0 = arith.constant 0 : i32
    %c0_i32_1 = arith.constant 0 : i32
    return %c0_i32, %c0_i32_0 : i32, i32
  }
  func.func @transform_12(%arg0: i32) -> (i32, i32) {
    %c0_i32 = arith.constant 0 : i32
    %c0_i32_0 = arith.constant 0 : i32
    %c0_i32_1 = arith.constant 0 : i32
    return %c0_i32, %c0_i32_0 : i32, i32
  }
  func.func @transform_13(%arg0: i32) -> (i32, i32) {
    %c0_i32 = arith.constant 0 : i32
    %c0_i32_0 = arith.constant 0 : i32
    %c0_i32_1 = arith.constant 0 : i32
    return %c0_i32, %c0_i32_0 : i32, i32
  }
  func.func @transform_14(%arg0: i32) -> (i32, i32) {
    %c0_i32 = arith.constant 0 : i32
    %c0_i32_0 = arith.constant 0 : i32
    %c0_i32_1 = arith.constant 0 : i32
    return %c0_i32, %c0_i32_0 : i32, i32
  }
  func.func @transform_15(%arg0: i32) -> (i32, i32) {
    %c0_i32 = arith.constant 0 : i32
    %c0_i32_0 = arith.constant 0 : i32
    %c0_i32_1 = arith.constant 0 : i32
    return %c0_i32, %c0_i32_0 : i32, i32
  }
  func.func @transform_16(%arg0: i32) -> (i32, i32) {
    %c0_i32 = arith.constant 0 : i32
    %c0_i32_0 = arith.constant 0 : i32
    %c0_i32_1 = arith.constant 0 : i32
    return %c0_i32, %c0_i32_0 : i32, i32
  }
  func.func @transform_17(%arg0: i32) -> (i32, i32) {
    %c0_i32 = arith.constant 0 : i32
    %c0_i32_0 = arith.constant 0 : i32
    %c0_i32_1 = arith.constant 0 : i32
    return %c0_i32, %c0_i32_0 : i32, i32
  }
  func.func @transform_18(%arg0: i32) -> (i32, i32) {
    %c0_i32 = arith.constant 0 : i32
    %c0_i32_0 = arith.constant 0 : i32
    %c0_i32_1 = arith.constant 0 : i32
    return %c0_i32, %c0_i32_0 : i32, i32
  }
  func.func @transform_19(%arg0: i32) -> (i32, i32) {
    %c0_i32 = arith.constant 0 : i32
    %c0_i32_0 = arith.constant 0 : i32
    %c0_i32_1 = arith.constant 0 : i32
    return %c0_i32, %c0_i32_0 : i32, i32
  }
  func.func @transform_20(%arg0: i32) -> (i32, i32) {
    %c0_i32 = arith.constant 0 : i32
    %c0_i32_0 = arith.constant 0 : i32
    %c0_i32_1 = arith.constant 0 : i32
    return %c0_i32, %c0_i32_0 : i32, i32
  }
  func.func @transform_21(%arg0: i32) -> (i32, i32) {
    %c0_i32 = arith.constant 0 : i32
    %c0_i32_0 = arith.constant 0 : i32
    %c0_i32_1 = arith.constant 0 : i32
    return %c0_i32, %c0_i32_0 : i32, i32
  }
  func.func @transform_22(%arg0: i32) -> (i32, i32) {
    %c0_i32 = arith.constant 0 : i32
    %c0_i32_0 = arith.constant 0 : i32
    %c0_i32_1 = arith.constant 0 : i32
    return %c0_i32, %c0_i32_0 : i32, i32
  }
}

</mosaic_0001>

<bundles_post_ra>
// kernel: tpu_custom_call.1
= control target key start
LH: loop header
LB: loop body
LE: loop exit
PB: predicated region body
PF: predicated region fallthrough
CT: control target
= control target key end

     0   :  { %s1934_s0 = inlined_call_operand.vmem [shape: f32[2,6], index: 0, kind: input, shape index: {}]   ;;  %s1935_s1 = inlined_call_operand.vmem [shape: f32[2,6], index: 1, kind: input, shape index: {}]   ;;  %s1936_s2 = inlined_call_operand.vmem [shape: f32[2,1], index: 2, kind: input, shape index: {}]   ;;  %s1937_s3 = inlined_call_operand.vmem [shape: f32[2,1], index: 3, kind: input, shape index: {}]   ;;  %s1938_s4 = inlined_call_operand.vmem [shape: f32[2,3], index: 4, kind: input, shape index: {}]   ;;  %s1939_s5 = inlined_call_operand.hbm [shape: f32[2,3], index: 5, kind: input, shape index: {}]   ;;  %s1940_s6 = inlined_call_operand.vmem [shape: f32[2,3], index: 6, kind: input, shape index: {}]   ;;  %s1941_s7 = inlined_call_operand.hbm [shape: f32[2,3], index: 7, kind: input, shape index: {}]   ;;  %s1942_s8 = inlined_call_operand.vmem [shape: f32[2,3], index: 8, kind: input, shape index: {}]   ;;  %s1943_s9 = inlined_call_operand.hbm [shape: f32[2,3], index: 9, kind: input, shape index: {}]   ;;  %s1944_s10 = inlined_call_operand.vmem [shape: f32[2,2], index: 10, kind: input, shape index: {}]   ;;  %s1945_s11 = inlined_call_operand.hbm [shape: f32[2,2], index: 11, kind: input, shape index: {}]   ;;  %s1946_s12 = inlined_call_operand.vmem [shape: f32[2,12], index: 12, kind: input, shape index: {}]   ;;  %s1947_s13 = inlined_call_operand.hbm [shape: f32[2,12], index: 13, kind: input, shape index: {}]   ;;  %s1948_s14 = inlined_call_operand.hbm [shape: f32[1,1], index: 14, kind: output, shape index: {0}]   ;;  %s1949_s15 = inlined_call_operand.hbm [shape: f32[1,1], index: 15, kind: output, shape index: {1}]   ;;  %s1950_s16 = inlined_call_operand.hbm [shape: f32[1,1], index: 16, kind: output, shape index: {2}]   ;;  %s1951_s17 = inlined_call_operand.hbm [shape: f32[1,1], index: 17, kind: output, shape index: {3}]   ;;  %s1952_s18 = inlined_call_operand.hbm [shape: f32[1,1], index: 18, kind: output, shape index: {4}]   ;;  %s1953_s19 = inlined_call_operand.hbm [shape: f32[1,1], index: 19, kind: output, shape index: {5}]   ;;  %s1954_s20 = inlined_call_operand.hbm [shape: f32[1,1], index: 20, kind: output, shape index: {6}]   ;;  %s1955_s21 = inlined_call_operand.hbm [shape: f32[1,1], index: 21, kind: output, shape index: {7}]   ;;  %s1956_s22 = inlined_call_operand.hbm [shape: f32[1,1], index: 22, kind: output, shape index: {8}]  }
   0x1   :  { %1957 = sst [smem:[#allocation32_spill]] %s1934_s0 }
   0x2   :  { %1958 = sst [smem:[#allocation33_spill]] %s1935_s1 }
   0x3   :  { %1959 = sst [smem:[#allocation34_spill]] %s1936_s2 }
   0x4   :  { %1960 = sst [smem:[#allocation35_spill]] %s1937_s3 }
   0x5   :  { %1961 = sst [smem:[#allocation36_spill]] %s1938_s4 }
   0x6   :  { %1962 = sst [smem:[#allocation37_spill]] %s1939_s5 }
   0x7   :  { %1963 = sst [smem:[#allocation38_spill]] %s1940_s6 }
   0x8   :  { %28 = vsyncpa [#allocation3], 0 }
   0x9   :  { %29 = vsyncpa [#allocation6], 0 }
   0xa   :  { %30 = vsyncpa [#allocation9], 0 }
   0xb   :  { %31 = vsyncpa [#allocation4], 0 }
   0xc   :  { %32 = vsyncpa [#allocation13], 0 }
   0xd   :  { %33 = vsyncpa [#allocation16], 0 }
   0xe   :  { %34 = vsyncpa [#allocation19], 0  ;;  %s64_s29 = sshll.u32 %s1941_s7, 4  ;;  %s65_s29 = int_to_ptr.hbm [resolvable:$true] %s64_s29 }
   0xf   :  { %35 = vsyncpa [#allocation22], 0  ;;  %s1441_s30 = smov [#allocation5]   ;;  %s90_s1 = sshll.u32 %s1945_s11, 4  ;;  %s91_s1 = int_to_ptr.hbm [resolvable:$true] %s90_s1 }
  0x10   :  { %s66_s4 = sshll.u32 %s1441_s30, 4  ;;  %s1442_s5 = smov [#allocation8]   ;;  %s67_s4 = int_to_ptr.vmem [resolvable:$true] %s66_s4 }
  0x11   :  { %69 = dma.hbm_to_vmem [thread:$0]  %s65_s29, 32, %s67_s4, [#allocation6]  }
  0x12   :  { %s92_s24 = sshll.u32 %s1442_s5, 4  ;;  %s1964_s26 = sld [smem:[#allocation37_spill]]  ;;  %s93_s24 = int_to_ptr.vmem [resolvable:$true] %s92_s24 }
  0x13   :  { %95 = dma.hbm_to_vmem [thread:$0]  %s91_s1, 32, %s93_s24, [#allocation9]  }
  0x14   :  { %s77_s3 = sshll.u32 %s1943_s9, 4  ;;  %s1443_s28 = smov [#allocation2]   ;;  %s78_s3 = int_to_ptr.hbm [resolvable:$true] %s77_s3 }
  0x15   :  { %s53_s30 = sshll.u32 %s1443_s28, 4  ;;  %s1444_s11 = smov [#allocation7]   ;;  %s54_s30 = int_to_ptr.vmem [resolvable:$true] %s53_s30 }
  0x16   :  { %s79_s29 = sshll.u32 %s1444_s11, 4  ;;  %s103_s23 = sshll.u32 %s1947_s13, 4  ;;  %s80_s29 = int_to_ptr.vmem [resolvable:$true] %s79_s29  ;;  %s104_s23 = int_to_ptr.hbm [resolvable:$true] %s103_s23 }
  0x17   :  { %82 = dma.hbm_to_vmem [thread:$0]  %s78_s3, 32, %s80_s29, [#allocation6]  }
  0x18   :  { %s51_s2 = sshll.u32 %s1964_s26, 4  ;;  %s1445_s5 = smov [#allocation10]   ;;  %s52_s2 = int_to_ptr.hbm [resolvable:$true] %s51_s2 }
  0x19   :  { %56 = dma.hbm_to_vmem [thread:$0]  %s52_s2, 32, %s54_s30, [#allocation3]  }
  0x1a   :  { %s105_s1 = sshll.u32 %s1445_s5, 4  ;;  %s106_s1 = int_to_ptr.vmem [resolvable:$true] %s105_s1 }
  0x1b   :  { %108 = dma.hbm_to_vmem [thread:$0]  %s104_s23, 32, %s106_s1, [#allocation9]  }
  0x1c   :  { %1425 = dma.done.wait [#allocation3], 32  }
  0x1d   :  { %1426 = vsyncadd [#allocation3], 4294967264 }
  0x1e   :  { %1427 = dma.done.wait [#allocation6], 64  }
  0x1f   :  { %1428 = vsyncadd [#allocation6], 4294967232 }
  0x20   :  { %1429 = dma.done.wait [#allocation9], 64  }
  0x21   :  { %1430 = vsyncadd [#allocation9], 4294967232  ;;  %s1965_s6 = sld [smem:[#allocation32_spill]]  ;;  %vm190_vm0 = vcmask 17408   ;;  %s1446_s13 = smov 125   ;;  %v1448_v34 = vmov 1  }
  0x22   :  { %s1447_s25 = smov 3   ;;  %1154 = vset.pattern.permute.xlu2 %v1448_v34  ;;  %1156 = vset.pattern.permute.xlu0 %v1448_v34  ;;  %v1633_v37 = vld [vmem:[%s1944_s10] sm:$0x3]  ;;  %s1449_s10 = smov 123   ;;  %vm159_vm13 = vcmask 1024   ;;  %vm133_vm14 = vcmask 41984  }
  0x23   :  { %s1450_s7 = smov 126   ;;  %s1451_s27 = smov 127   ;;  %v1651_v63 = vld [vmem:[%s1946_s12] sm:$0x3]  ;;  %vm266_vm15 = vcmask 9216  }
  0x24   :  { %s1452_s3 = smov 124   ;;  %s1453_s11 = smov 122  }
  0x25   :  { %s1455_s29 = smov 2   ;;  %s1966_s0 = sld [smem:[#allocation34_spill]] }
  0x26   :  { %s1967_s1 = sld [smem:[#allocation35_spill]]  ;;  %s1458_s5 = smov 119  }
  0x27   :  { %v1613_v0 = vld [vmem:[%s1965_s6] sm:$0x3]  ;;  %s1968_s6 = sld [smem:[#allocation33_spill]] }
  0x28   :  { %v314_v1 = vmul.f32 %v1613_v0, %v1613_v0  ;;  %s1969_s12 = sld [smem:[#allocation38_spill]] }
  0x29   :  { %s1970_s23 = sld [smem:[#allocation36_spill]] }
  0x2a   :  { %v315_v2 = vsel %vm190_vm0, %v314_v1, 0.0  ;;  %v1454_v1 = vmov 0  }
  0x2b   :  { %316 = vadd.xlane.f32.xlu0 %v315_v2 }
  0x3f   :  { %347 = vrot.lane.b32.xlu0 %v1613_v0, %s1446_s13 }
  0x9e   :  { %v317_v3 = vpop.xlane.xlu0 %316 }
  0x9f   :  { %1157 = vrsqrt.f32 %v317_v3  ;;  %vm325_vm1 = vcmp.eq.f32.partialorder %v317_v3, inf  ;;  %v328_v11 = vand.u32 2147483648, %v317_v3  ;;  %vm327_vm2 = vcmp.eq.f32.partialorder %v317_v3, 0.0 }
  0xa5   :  { %v1158_v4 = vpop.eup %1157 }
  0xa6   :  { %v319_v5 = vmul.f32 %v1158_v4, %v317_v3 }
  0xa8   :  { %v320_v6 = vmul.f32 %v1158_v4, %v319_v5 }
  0xaa   :  { %v321_v7 = vmul.f32 0.5, %v320_v6  ;;  %v155_v6 = vld [vmem:[%s1966_s0] sm:$0x3] }
  0xac   :  { %v322_v8 = vsub.f32 1.5, %v321_v7  ;;  %v156_v7 = vld [vmem:[%s1967_s1] sm:$0x3] }
  0xae   :  { %v323_v9 = vmul.f32 %v1158_v4, %v322_v8  ;;  %v157_v8 = vsub.f32 %v155_v6, %v156_v7 }
  0xb0   :  { %v324_v10 = vmul.f32 %v323_v9, %v317_v3  ;;  %v158_v9 = vand.u32 2147483647, %v157_v8 }
  0xb1   :  { %v348_v25 = vpop.permute.xlu0 %347 }
  0xb2   :  { %v326_v12 = vsel %vm325_vm1, %v317_v3, %v324_v10  ;;  %v160_v10 = vsel %vm159_vm13, %v158_v9, 0.0  ;;  %vm292_vm1 = vcmask 91136  }
  0xb3   :  { %v329_v13 = vsel %vm327_vm2, %v328_v11, %v326_v12  ;;  %v130_v11 = vld [vmem:[%s1968_s6] sm:$0x3]  ;;  %s1461_s6 = smov 10  }
  0xb4   :  { %v330_v14 = vadd.f32 1e-08, %v329_v13  ;;  %v237_v12 = vld [vmem:[%s1942_s8] sm:$0x3]  ;;  %v238_v13 = vld [vmem:[#allocation7] sm:$0x3] }
  0xb5   :  { %s1456_s8 = smov 6  }
  0xb6   :  { %1159 = vrcp.f32 %v330_v14  ;;  %v342_v18 = vand.u32 2147483648, %v330_v14  ;;  %v340_v20 = vand.u32 2147483647, %v330_v14  ;;  %vm336_vm4 = vweird.f32 %v330_v14 }
  0xb8   :  { %v343_v22 = vor.u32 1.1754944e-38, %v342_v18  ;;  %vm341_vm6 = vcmp.eq.f32.partialorder %v340_v20, 8.507059e+37 }
  0xbc   :  { %v1160_v15 = vpop.eup %1159 }
  0xbd   :  { %v332_v16 = vmul.f32 %v1160_v15, %v330_v14  ;;  %vm337_vm3 = vweird.f32 %v1160_v15  ;;  %v263_v14 = vld [vmem:[#allocation8] sm:$0x3] }
  0xbe   :  { %vm338_vm5 = vmor %vm336_vm4, %vm337_vm3  ;;  %v264_v18 = vsub.f32 %v1633_v37, %v263_v14  ;;  %vm434_vm4 = vcmask 7168  }
  0xbf   :  { %v333_v17 = vsub.f32 1.0, %v332_v16  ;;  %v239_v16 = vsub.f32 %v237_v12, %v238_v13 }
  0xc1   :  { %v334_v19 = vmul.f32 %v1160_v15, %v333_v17  ;;  %v240_v17 = vmul.f32 %v239_v16, %v239_v16 }
  0xc3   :  { %v335_v21 = vadd.f32 %v1160_v15, %v334_v19  ;;  %v241_v20 = vsel %vm190_vm0, %v240_v17, 0.0 }
  0xc5   :  { %v339_v23 = vsel %vm338_vm5, %v1160_v15, %v335_v21  ;;  %v131_v15 = vsub.f32 %v1613_v0, %v130_v11  ;;  %v265_v21 = vand.u32 2147483647, %v264_v18  ;;  %vm436_vm5 = vcmask 15360  }
  0xc6   :  { %v344_v24 = vsel %vm341_vm6, %v343_v22, %v339_v23  ;;  %v289_v22 = vld [vmem:[#allocation10] sm:$0x3] }
  0xc7   :  { %v1621_v26 = vmul.f32 %v344_v24, %v1613_v0  ;;  %v132_v19 = vmul.f32 %v131_v15, %v131_v15  ;;  %v267_v24 = vsel %vm266_vm15, %v265_v21, 0.0 }
  0xc9   :  { %v350_v27 = vmul.f32 %v348_v25, %v1621_v26  ;;  %v134_v23 = vsel %vm133_vm14, %v132_v19, 0.0  ;;  %v290_v25 = vsub.f32 %v1651_v63, %v289_v22 }
  0xcb   :  { %v351_v28 = vsel %vm190_vm0, %v350_v27, 0.0  ;;  %v291_v27 = vmul.f32 %v290_v25, %v290_v25 }
  0xcc   :  { %352 = vadd.xlane.f32.xlu1 %v351_v28 }
 0x13f   :  { %v353_v29 = vpop.xlane.xlu1 %352 }
 0x140   :  { %v354_v30 = vmul.f32 %v353_v29, %v1621_v26 }
 0x142   :  { %356 = vrot.lane.b32.xlu1 %v354_v30, %s1447_s25 }
 0x1b4   :  { %v357_v31 = vpop.permute.xlu1 %356 }
 0x1b5   :  { %v359_v32 = vsub.f32 %v1613_v0, %v357_v31  ;;  %v293_v0 = vsel %vm292_vm1, %v291_v27, 0.0  ;;  %v1459_v27 = vmov 2.0  }
 0x1b7   :  { %v360_v33 = vmul.f32 %v359_v32, %v359_v32 }
 0x1b9   :  { %362 = vrot.lane.b32.xlu2 %v360_v33, %s1446_s13  ;;  %v213_v33 = vld [vmem:[#allocation5] sm:$0x3] }
 0x213   :  { %v363_v35 = vpop.permute.xlu2 %362 }
 0x214   :  { %v365_v36 = vsel %vm190_vm0, %v363_v35, 0.0 }
 0x215   :  { %366 = vadd.xlane.f32.xlu2 %v365_v36 }
 0x22d   :  { %446 = vperm.xlu2 %1154, %v1633_v37  }
 0x235   :  { %1155 = vset.pattern.permute.xlu2 %v1454_v1 }
 0x236   :  { %440 = vperm.xlu2 %1155, %v1633_v37  }
 0x25f   :  { %161 = vadd.xlane.f32.xlu2 %v160_v10 }
 0x267   :  { %242 = vadd.xlane.f32.xlu2 %v241_v20 }
 0x26f   :  { %268 = vadd.xlane.f32.xlu2 %v267_v24 }
 0x277   :  { %294 = vadd.xlane.f32.xlu2 %v293_v0 }
 0x288   :  { %v367_v38 = vpop.xlane.xlu2 %366 }
 0x289   :  { %1161 = vrsqrt.f32 %v367_v38  ;;  %vm375_vm7 = vcmp.eq.f32.partialorder %v367_v38, inf  ;;  %v378_v46 = vand.u32 2147483648, %v367_v38  ;;  %vm377_vm8 = vcmp.eq.f32.partialorder %v367_v38, 0.0 }
 0x28f   :  { %v1162_v39 = vpop.eup %1161 }
 0x290   :  { %v369_v40 = vmul.f32 %v1162_v39, %v367_v38  ;;  %v447_v61 = vpop.permute.xlu2 %446 }
 0x292   :  { %v370_v41 = vmul.f32 %v1162_v39, %v369_v40 }
 0x294   :  { %v371_v42 = vmul.f32 0.5, %v370_v41 }
 0x296   :  { %v372_v43 = vsub.f32 1.5, %v371_v42 }
 0x298   :  { %v373_v44 = vmul.f32 %v1162_v39, %v372_v43  ;;  %v441_v12 = vpop.permute.xlu2 %440 }
 0x29a   :  { %v374_v45 = vmul.f32 %v373_v44, %v367_v38 }
 0x29c   :  { %v376_v47 = vsel %vm375_vm7, %v367_v38, %v374_v45 }
 0x29d   :  { %v379_v48 = vsel %vm377_vm8, %v378_v46, %v376_v47 }
 0x29e   :  { %v380_v49 = vadd.f32 1e-08, %v379_v48  ;;  %v181_v48 = vld [vmem:[%s1970_s23] sm:$0x3] }
 0x2a0   :  { %1163 = vrcp.f32 %v380_v49  ;;  %v392_v53 = vand.u32 2147483648, %v380_v49  ;;  %v390_v55 = vand.u32 2147483647, %v380_v49  ;;  %vm386_vm10 = vweird.f32 %v380_v49 }
 0x2a2   :  { %v393_v57 = vor.u32 1.1754944e-38, %v392_v53  ;;  %vm391_vm12 = vcmp.eq.f32.partialorder %v390_v55, 8.507059e+37 }
 0x2a6   :  { %v1164_v50 = vpop.eup %1163 }
 0x2a7   :  { %v382_v51 = vmul.f32 %v1164_v50, %v380_v49  ;;  %vm387_vm9 = vweird.f32 %v1164_v50  ;;  %v182_v49 = vld [vmem:[#allocation2] sm:$0x3] }
 0x2a8   :  { %vm388_vm11 = vmor %vm386_vm10, %vm387_vm9 }
 0x2a9   :  { %v383_v52 = vsub.f32 1.0, %v382_v51 }
 0x2ab   :  { %v384_v54 = vmul.f32 %v1164_v50, %v383_v52  ;;  %v1457_v52 = vmov 12.0  }
 0x2ac   :  { %1165 = vrcp.f32 %v1457_v52 }
 0x2ad   :  { %v385_v56 = vadd.f32 %v1164_v50, %v384_v54  ;;  %1167 = vrcp.f32 %v1459_v27 }
 0x2af   :  { %v389_v58 = vsel %vm388_vm11, %v1164_v50, %v385_v56  ;;  %v183_v50 = vsub.f32 %v181_v48, %v182_v49 }
 0x2b0   :  { %v394_v59 = vsel %vm391_vm12, %v393_v57, %v389_v58 }
 0x2b1   :  { %v1636_v60 = vmul.f32 %v394_v59, %v359_v32  ;;  %v212_v32 = vld [vmem:[%s1969_s12] sm:$0x3]  ;;  %v184_v53 = vand.u32 2147483647, %v183_v50 }
 0x2b2   :  { %v214_v34 = vsub.f32 %v212_v32, %v213_v33  ;;  %v1166_v58 = vpop.eup %1165 }
 0x2b3   :  { %414 = vrot.lane.b32.xlu1 %v1636_v60, %s1449_s10  ;;  %401 = vrot.lane.b32.xlu0 %v1636_v60, %s1450_s7  ;;  %v449_v62 = vmul.f32 %v447_v61, %v1636_v60  ;;  %vm185_vm2 = vcmp.lt.f32.partialorder %v184_v53, 1.0  ;;  %v1084_v56 = vadd.f32 -0.5, %v184_v53  ;;  %v145_v61 = vmul.f32 12.0, %v1166_v58 }
 0x2b4   :  { %v215_v35 = vmul.f32 %v214_v34, %v214_v34  ;;  %vm149_vm3 = vweird.f32 %v1166_v58  ;;  %v455_v7 = vmul.f32 %v1636_v60, %v1636_v60  ;;  %v1168_v34 = vpop.eup %1167 }
 0x2b5   :  { %v146_v1 = vsub.f32 1.0, %v145_v61  ;;  %vm175_vm6 = vweird.f32 %v1168_v34 }
 0x2b6   :  { %v216_v37 = vsel %vm190_vm0, %v215_v35, 0.0 }
 0x2bb   :  { %410 = vrot.lane.b32.xlu1 %v1636_v60, %s1451_s27  ;;  %397 = vrot.lane.b32.xlu0 %v1636_v60, %s1452_s3 }
 0x2c3   :  { %451 = vrot.lane.b32.xlu1 %v449_v62, %s1446_s13 }
 0x2cb   :  { %754 = vrot.lane.b32.xlu1 %v1651_v63, %s1453_s11 }
 0x2d2   :  { %v162_v18 = vpop.xlane.xlu2 %161 }
 0x2d3   :  { %v163_v20 = vrot.slane %v162_v18, 4 }
 0x2d5   :  { %v164_v24 = vadd.f32 %v163_v20, %v162_v18 }
 0x325   :  { %v415_v2 = vpop.permute.xlu1 %414  ;;  %v402_v3 = vpop.permute.xlu0 %401 }
 0x326   :  { %v417_v4 = vmul.f32 %v415_v2, %v1621_v26  ;;  %v404_v5 = vmul.f32 %v402_v3, %v1621_v26  ;;  %v147_v2 = vmul.f32 %v1166_v58, %v146_v1 }
 0x328   :  { %406 = vrot.lane.b32.xlu0 %v404_v5, %s1451_s27  ;;  %419 = vrot.lane.b32.xlu1 %v417_v4, %s1455_s29  ;;  %v148_v5 = vadd.f32 %v1166_v58, %v147_v2 }
 0x32a   :  { %v150_v6 = vsel %vm149_vm3, %v1166_v58, %v148_v5  ;;  %v243_v58 = vpop.xlane.xlu2 %242 }
 0x32b   :  { %v244_v61 = vrot.slane %v243_v58, 4 }
 0x32d   :  { %v411_v28 = vpop.permute.xlu1 %410  ;;  %v398_v36 = vpop.permute.xlu0 %397 }
 0x32e   :  { %v400_v38 = vmul.f32 %v398_v36, %v1621_v26  ;;  %v413_v42 = vmul.f32 %v411_v28, %v1621_v26  ;;  %v186_v26 = vmul.f32 0.5, %v183_v50  ;;  %v1460_v28 = vmov 6.0  }
 0x32f   :  { %1169 = vrcp.f32 %v1460_v28 }
 0x330   :  { %v187_v55 = vmul.f32 %v186_v26, %v183_v50 }
 0x332   :  { %v189_v59 = vsel %vm185_vm2, %v187_v55, %v1084_v56 }
 0x333   :  { %v191_v62 = vsel %vm190_vm0, %v189_v59, 0.0 }
 0x335   :  { %v1679_v29 = vpop.permute.xlu1 %451  ;;  %v1170_v36 = vpop.eup %1169 }
 0x336   :  { %vm206_vm7 = vweird.f32 %v1170_v36 }
 0x33d   :  { %v1681_v30 = vpop.permute.xlu1 %754 }
 0x33e   :  { %v1685_v31 = vsub.f32 %v1651_v63, %v1681_v30 }
 0x340   :  { %851 = vrot.lane.b32.xlu2 %v1685_v31, %s1450_s7 }
 0x352   :  { %135 = vadd.xlane.f32.xlu0 %v134_v23 }
 0x366   :  { %668 = vrot.lane.b32.xlu0 %v1651_v63, %s1456_s8 }
 0x390   :  { %217 = vadd.xlane.f32.xlu0 %v216_v37  ;;  %v171_v37 = vmul.f32 2.0, %v1168_v34 }
 0x39a   :  { %v407_v39 = vpop.permute.xlu0 %406  ;;  %v420_v41 = vpop.permute.xlu1 %419 }
 0x39b   :  { %v409_v40 = vsub.f32 %v400_v38, %v407_v39  ;;  %v422_v43 = vsub.f32 %v413_v42, %v420_v41  ;;  %v172_v41 = vsub.f32 1.0, %v171_v37 }
 0x39d   :  { %424 = vrot.lane.b32.xlu1 %v409_v40, %s1451_s27 }
 0x3a5   :  { %428 = vrot.lane.b32.xlu1 %v422_v43, %s1451_s27 }
 0x3ad   :  { %431 = vrot.lane.b32.xlu1 %v409_v40, %s1455_s29  ;;  %v202_v40 = vmul.f32 6.0, %v1170_v36 }
 0x3c5   :  { %v136_v44 = vpop.xlane.xlu0 %135 }
 0x3c6   :  { %v137_v45 = vrot.slane %v136_v44, 4 }
 0x3c8   :  { %v138_v46 = vadd.f32 %v137_v45, %v136_v44  ;;  %v203_v45 = vsub.f32 1.0, %v202_v40 }
 0x3ca   :  { %v139_v47 = vrot.slane %v138_v46, 2  ;;  %v204_v49 = vmul.f32 %v1170_v36, %v203_v45 }
 0x3cc   :  { %v140_v51 = vadd.f32 %v139_v47, %v138_v46  ;;  %v173_v46 = vmul.f32 %v1168_v34, %v172_v41  ;;  %v205_v53 = vadd.f32 %v1170_v36, %v204_v49 }
 0x3ce   :  { %v141_v54 = vrot.slane %v140_v51, 1  ;;  %v174_v50 = vadd.f32 %v1168_v34, %v173_v46  ;;  %v207_v56 = vsel %vm206_vm7, %v1170_v36, %v205_v53 }
 0x3d0   :  { %v142_v57 = vadd.f32 %v141_v54, %v140_v51  ;;  %v176_v54 = vsel %vm175_vm6, %v1168_v34, %v174_v50 }
 0x3d2   :  { %1085 = vpush %v142_v57 }
 0x3d3   :  { %1087 = vpush %v150_v6 }
 0x3d7   :  { %192 = vadd.xlane.f32.xlu1 %v191_v62  ;;  %v245_v62 = vadd.f32 %v244_v61, %v243_v58 }
 0x3d8   :  { %v669_v3 = vpop.permute.xlu0 %668 }
 0x3d9   :  { %v671_v4 = vsub.f32 %v1651_v63, %v669_v3 }
 0x3db   :  { %690 = vrot.lane.b32.xlu0 %v671_v4, %s1449_s10 }
 0x3e3   :  { %841 = vrot.lane.b32.xlu0 %v1651_v63, %s1458_s5 }
 0x3eb   :  { %457 = vrot.lane.b32.xlu0 %v455_v7, %s1446_s13  ;;  %v1462_v7 = vmov 4.0  }
 0x3ec   :  { %1171 = vrcp.f32 %v1462_v7 }
 0x3f0   :  { %497 = vrot.lane.b32.xlu1 %v1651_v63, %s1447_s25 }
 0x3f3   :  { %686 = vrot.lane.b32.xlu0 %v671_v4, %s1451_s27 }
 0x403   :  { %s1086_s1 = spop %1085  ;;  %v218_v17 = vpop.xlane.xlu0 %217 }
 0x404   :  { %s1088_s9 = spop %1087  ;;  %v219_v22 = vrot.slane %v218_v17, 4 }
 0x405   :  { %s152_s24 = smul.f32 %s1088_s9, %s1086_s1  ;;  %s1466_s1 = smov 8  }
 0x406   :  { %v220_v0 = vadd.f32 %v219_v22, %v218_v17  ;;  %v1463_v22 = vmov 24.0  }
 0x407   :  { %154 = sst [smem:[#allocation11]] %s152_s24  ;;  %1173 = vrcp.f32 %v1463_v22 }
 0x408   :  { %v221_v33 = vrot.slane %v220_v0, 2 }
 0x40a   :  { %v222_v42 = vadd.f32 %v221_v33, %v220_v0 }
 0x40c   :  { %v223_v47 = vrot.slane %v222_v42, 1 }
 0x40e   :  { %v224_v55 = vadd.f32 %v223_v47, %v222_v42 }
 0x40f   :  { %v425_v8 = vpop.permute.xlu1 %424 }
 0x417   :  { %v429_v9 = vpop.permute.xlu1 %428 }
 0x418   :  { %v435_v10 = vsel %vm434_vm4, %v425_v8, %v429_v9 }
 0x41f   :  { %v432_v11 = vpop.permute.xlu1 %431 }
 0x420   :  { %v437_v13 = vsel %vm436_vm5, %v435_v10, %v432_v11 }
 0x421   :  { %v443_v14 = vmul.f32 %v441_v12, %v437_v13 }
 0x423   :  { %v444_v15 = vadd.f32 %v443_v14, %v1651_v63 }
 0x425   :  { %v1716_v16 = vadd.f32 %v1679_v29, %v444_v15  ;;  %v165_v29 = vrot.slane %v164_v24, 2  ;;  %v1172_v15 = vpop.eup %1171 }
 0x426   :  { %v278_v20 = vmul.f32 4.0, %v1172_v15  ;;  %vm282_vm8 = vweird.f32 %v1172_v15  ;;  %v1174_v28 = vpop.eup %1173 }
 0x427   :  { %501 = vrot.lane.b32.xlu1 %v1716_v16, %s1456_s8  ;;  %v166_v38 = vadd.f32 %v165_v29, %v164_v24  ;;  %v1733_v57 = vsub.f32 %v1716_v16, %v1681_v30  ;;  %v269_v30 = vpop.xlane.xlu2 %268  ;;  %v304_v33 = vmul.f32 24.0, %v1174_v28  ;;  %vm308_vm9 = vweird.f32 %v1174_v28 }
 0x428   :  { %v270_v1 = vrot.slane %v269_v30, 4  ;;  %v279_v24 = vsub.f32 1.0, %v278_v20 }
 0x429   :  { %v167_v43 = vrot.slane %v166_v38, 1  ;;  %v305_v34 = vsub.f32 1.0, %v304_v33 }
 0x42a   :  { %v271_v5 = vadd.f32 %v270_v1, %v269_v30  ;;  %v280_v0 = vmul.f32 %v1172_v15, %v279_v24 }
 0x42b   :  { %v168_v48 = vadd.f32 %v167_v43, %v166_v38  ;;  %v306_v37 = vmul.f32 %v1174_v28, %v305_v34 }
 0x42c   :  { %v272_v8 = vrot.slane %v271_v5, 2 }
 0x42d   :  { %1089 = vpush %v168_v48 }
 0x42e   :  { %1091 = vpush %v176_v54 }
 0x42f   :  { %677 = vrot.lane.b32.xlu1 %v671_v4, %s1450_s7  ;;  %v295_v14 = vpop.xlane.xlu2 %294 }
 0x430   :  { %v296_v17 = vrot.slane %v295_v14, 4 }
 0x437   :  { %864 = vrot.lane.b32.xlu1 %v1685_v31, %s1449_s10  ;;  %v852_v42 = vpop.permute.xlu2 %851 }
 0x43f   :  { %673 = vrot.lane.b32.xlu1 %v671_v4, %s1452_s3  ;;  %v246_v4 = vrot.slane %v245_v62, 2 }
 0x441   :  { %v247_v9 = vadd.f32 %v246_v4, %v245_v62 }
 0x443   :  { %v248_v13 = vrot.slane %v247_v9, 1 }
 0x445   :  { %v249_v18 = vadd.f32 %v248_v13, %v247_v9 }
 0x44a   :  { %v193_v19 = vpop.xlane.xlu1 %192 }
 0x44b   :  { %v194_v21 = vrot.slane %v193_v19, 4 }
 0x44d   :  { %v1724_v23 = vpop.permute.xlu0 %690  ;;  %v195_v25 = vadd.f32 %v194_v21, %v193_v19  ;;  %v273_v19 = vadd.f32 %v272_v8, %v271_v5 }
 0x44f   :  { %v196_v32 = vrot.slane %v195_v25, 2  ;;  %v274_v21 = vrot.slane %v273_v19, 1 }
 0x451   :  { %v197_v39 = vadd.f32 %v196_v32, %v195_v25  ;;  %v297_v25 = vadd.f32 %v296_v17, %v295_v14  ;;  %v275_v27 = vadd.f32 %v274_v21, %v273_v19 }
 0x453   :  { %v198_v44 = vrot.slane %v197_v39, 1  ;;  %v298_v29 = vrot.slane %v297_v25, 2 }
 0x455   :  { %v1726_v35 = vpop.permute.xlu0 %841  ;;  %v199_v51 = vadd.f32 %v198_v44, %v197_v39  ;;  %v299_v36 = vadd.f32 %v298_v29, %v297_v25  ;;  %v307_v39 = vadd.f32 %v1174_v28, %v306_v37 }
 0x456   :  { %v1782_v49 = vsub.f32 %v1716_v16, %v1726_v35 }
 0x457   :  { %1093 = vpush %v199_v51  ;;  %v300_v38 = vrot.slane %v299_v36, 1  ;;  %v309_v41 = vsel %vm308_vm9, %v1174_v28, %v307_v39 }
 0x458   :  { %1095 = vpush %v207_v56  ;;  %v854_v50 = vmul.f32 %v852_v42, %v1782_v49 }
 0x459   :  { %1097 = vpush %v224_v55  ;;  %v301_v40 = vadd.f32 %v300_v38, %v299_v36 }
 0x45a   :  { %1099 = vpush %v249_v18 }
 0x45b   :  { %1101 = vpush %v275_v27 }
 0x45d   :  { %v458_v52 = vpop.permute.xlu0 %457 }
 0x45e   :  { %v460_v26 = vsel %vm190_vm0, %v458_v52, 0.0  ;;  %s1090_s26 = spop %1089 }
 0x45f   :  { %461 = vadd.xlane.f32.xlu2 %v460_v26  ;;  %s1736_s2 = spop %1091 }
 0x460   :  { %s178_s28 = smul.f32 %s1736_s2, %s1090_s26 }
 0x462   :  { %v498_v59 = vpop.permute.xlu1 %497  ;;  %180 = sst [smem:[#allocation12]] %s178_s28 }
 0x463   :  { %v1751_v6 = vsub.f32 %v1651_v63, %v498_v59 }
 0x465   :  { %v693_v12 = vmul.f32 %v1724_v23, %v1751_v6  ;;  %v281_v23 = vadd.f32 %v1172_v15, %v280_v0  ;;  %v687_v52 = vpop.permute.xlu0 %686 }
 0x466   :  { %v689_v54 = vmul.f32 %v687_v52, %v1751_v6 }
 0x467   :  { %v1760_v32 = vsel %vm282_vm8, %v1172_v15, %v281_v23 }
 0x468   :  { %1103 = vpush %v1760_v32 }
 0x469   :  { %1105 = vpush %v301_v40 }
 0x46a   :  { %1107 = vpush %v309_v41 }
 0x477   :  { %492 = vrot.lane.b32.xlu2 %v1716_v16, %s1447_s25 }
 0x47f   :  { %763 = vrot.lane.b32.xlu2 %v1733_v57, %s1461_s6 }
 0x488   :  { %s1094_s30 = spop %1093 }
 0x489   :  { %s1739_s12 = spop %1095 }
 0x48a   :  { %s209_s4 = smul.f32 %s1739_s12, %s1094_s30  ;;  %s1098_s0 = spop %1097 }
 0x48b   :  { %s234_s23 = smul.f32 %s1098_s0, %s1739_s12  ;;  %s1100_s9 = spop %1099 }
 0x48c   :  { %211 = sst [smem:[#allocation14]] %s209_s4  ;;  %s259_s24 = smul.f32 %s1100_s9, %s1739_s12 }
 0x48d   :  { %236 = sst [smem:[#allocation15]] %s234_s23  ;;  %s1102_s6 = spop %1101 }
 0x48e   :  { %261 = sst [smem:[#allocation17]] %s259_s24  ;;  %s1467_s12 = smov 121  }
 0x48f   :  { %s1468_s23 = smov 118   ;;  %s1008_s9 = sshll.u32 %s1953_s19, 4  ;;  %s1009_s9 = int_to_ptr.hbm [resolvable:$true] %s1008_s9 }
 0x490   :  { %s1472_s24 = smov [#allocation18]   ;;  %s999_s19 = sshll.u32 %s1952_s18, 4  ;;  %s1000_s19 = int_to_ptr.hbm [resolvable:$true] %s999_s19 }
 0x499   :  { %v502_v2 = vpop.permute.xlu1 %501  ;;  %s1104_s26 = spop %1103 }
 0x49a   :  { %v1744_v3 = vsub.f32 %v1651_v63, %v502_v2  ;;  %s285_s28 = smul.f32 %s1104_s26, %s1102_s6  ;;  %s1106_s30 = spop %1105 }
 0x49b   :  { %s1108_s4 = spop %1107  ;;  %s1479_s6 = smov [#allocation23]  }
 0x49c   :  { %592 = vrot.lane.b32.xlu0 %v1744_v3, %s1450_s7  ;;  %605 = vrot.lane.b32.xlu2 %v1744_v3, %s1449_s10  ;;  %s1464_s10 = smov 7   ;;  %s1465_s7 = smov 11  }
 0x49d   :  { %287 = sst [smem:[#allocation18]] %s285_s28  ;;  %s311_s0 = smul.f32 %s1108_s4, %s1106_s30 }
 0x49e   :  { %1011 = dma.smem_to_hbm %s1472_s24, 16, %s1009_s9, [#allocation19]  }
 0x49f   :  { %313 = sst [smem:[#allocation20]] %s311_s0  ;;  %s981_s30 = sshll.u32 %s1950_s16, 4  ;;  %s982_s30 = int_to_ptr.hbm [resolvable:$true] %s981_s30 }
 0x4a0   :  { %s1473_s4 = smov [#allocation11]   ;;  %s1474_s0 = smov [#allocation14]  }
 0x4a1   :  { %v678_v10 = vpop.permute.xlu1 %677  ;;  %s1478_s24 = smov [#allocation21]  }
 0x4a2   :  { %v680_v11 = vmul.f32 %v678_v10, %v1751_v6 }
 0x4a4   :  { %682 = vrot.lane.b32.xlu1 %v680_v11, %s1451_s27  ;;  %695 = vrot.lane.b32.xlu0 %v693_v12, %s1455_s29 }
 0x4a9   :  { %v865_v51 = vpop.permute.xlu1 %864 }
 0x4aa   :  { %v867_v1 = vmul.f32 %v865_v51, %v1782_v49 }
 0x4ac   :  { %776 = vrot.lane.b32.xlu1 %v1733_v57, %s1464_s10  ;;  %772 = vrot.lane.b32.xlu0 %v1733_v57, %s1465_s7  ;;  %s1471_s10 = smov [#allocation15]  }
 0x4b1   :  { %v674_v53 = vpop.permute.xlu1 %673 }
 0x4b2   :  { %v676_v4 = vmul.f32 %v674_v53, %v1751_v6 }
 0x4b4   :  { %759 = vrot.lane.b32.xlu1 %v1733_v57, %s1466_s1  ;;  %847 = vrot.lane.b32.xlu0 %v1685_v31, %s1452_s3 }
 0x4bc   :  { %860 = vrot.lane.b32.xlu1 %v1685_v31, %s1451_s27  ;;  %601 = vrot.lane.b32.xlu0 %v1744_v3, %s1451_s27 }
 0x4c4   :  { %588 = vrot.lane.b32.xlu1 %v1744_v3, %s1452_s3 }
 0x4d2   :  { %v462_v43 = vpop.xlane.xlu2 %461 }
 0x4d3   :  { %1175 = vrsqrt.f32 %v462_v43  ;;  %vm470_vm10 = vcmp.eq.f32.partialorder %v462_v43, inf  ;;  %v473_v15 = vand.u32 2147483648, %v462_v43  ;;  %vm472_vm11 = vcmp.eq.f32.partialorder %v462_v43, 0.0 }
 0x4d9   :  { %v1176_v7 = vpop.eup %1175 }
 0x4da   :  { %v493_v44 = vpop.permute.xlu2 %492  ;;  %v464_v8 = vmul.f32 %v1176_v7, %v462_v43 }
 0x4db   :  { %v1776_v31 = vsub.f32 %v1651_v63, %v493_v44 }
 0x4dc   :  { %v465_v9 = vmul.f32 %v1176_v7, %v464_v8 }
 0x4de   :  { %v466_v10 = vmul.f32 0.5, %v465_v9 }
 0x4e0   :  { %v467_v11 = vsub.f32 1.5, %v466_v10 }
 0x4e2   :  { %v764_v45 = vpop.permute.xlu2 %763  ;;  %v468_v12 = vmul.f32 %v1176_v7, %v467_v11 }
 0x4e3   :  { %v766_v46 = vmul.f32 %v764_v45, %v1751_v6 }
 0x4e4   :  { %v469_v13 = vmul.f32 %v468_v12, %v462_v43 }
 0x4e5   :  { %768 = vrot.lane.b32.xlu2 %v766_v46, %s1451_s27 }
 0x4e6   :  { %v471_v14 = vsel %vm470_vm10, %v462_v43, %v469_v13 }
 0x4e7   :  { %v474_v17 = vsel %vm472_vm11, %v473_v15, %v471_v14 }
 0x4e8   :  { %v475_v18 = vadd.f32 1e-06, %v474_v17 }
 0x4ea   :  { %1177 = vrcp.f32 %v475_v18  ;;  %v487_v38 = vand.u32 2147483648, %v475_v18  ;;  %vm481_vm14 = vweird.f32 %v475_v18  ;;  %v485_v39 = vand.u32 2147483647, %v475_v18 }
 0x4ec   :  { %v488_v41 = vor.u32 1.1754944e-38, %v487_v38  ;;  %vm486_vm1 = vcmp.eq.f32.partialorder %v485_v39, 8.507059e+37 }
 0x4f0   :  { %v1178_v22 = vpop.eup %1177 }
 0x4f1   :  { %v477_v27 = vmul.f32 %v1178_v22, %v475_v18  ;;  %vm482_vm12 = vweird.f32 %v1178_v22 }
 0x4f2   :  { %vm483_vm15 = vmor %vm481_vm14, %vm482_vm12 }
 0x4f3   :  { %v478_v29 = vsub.f32 1.0, %v477_v27 }
 0x4f5   :  { %v479_v34 = vmul.f32 %v1178_v22, %v478_v29 }
 0x4f6   :  { %v606_v47 = vpop.permute.xlu2 %605 }
 0x4f7   :  { %v608_v48 = vmul.f32 %v606_v47, %v1776_v31  ;;  %v480_v37 = vadd.f32 %v1178_v22, %v479_v34 }
 0x4f9   :  { %610 = vrot.lane.b32.xlu0 %v608_v48, %s1455_s29  ;;  %v484_v40 = vsel %vm483_vm15, %v1178_v22, %v480_v37 }
 0x4fa   :  { %v489_v42 = vsel %vm486_vm1, %v488_v41, %v484_v40 }
 0x4fb   :  { %v490_v44 = vmul.f32 %v489_v42, %v1636_v60 }
 0x501   :  { %856 = vrot.lane.b32.xlu0 %v854_v50, %s1451_s27 }
 0x50e   :  { %v593_v26 = vpop.permute.xlu0 %592 }
 0x50f   :  { %v595_v30 = vmul.f32 %v593_v26, %v1776_v31 }
 0x516   :  { %v683_v55 = vpop.permute.xlu1 %682  ;;  %v696_v56 = vpop.permute.xlu0 %695 }
 0x517   :  { %v698_v57 = vsub.f32 %v689_v54, %v696_v56  ;;  %v685_v5 = vsub.f32 %v676_v4, %v683_v55 }
 0x519   :  { %704 = vrot.lane.b32.xlu0 %v698_v57, %s1467_s12 }
 0x51e   :  { %v777_v58 = vpop.permute.xlu1 %776  ;;  %v1788_v59 = vpop.permute.xlu0 %772 }
 0x51f   :  { %v779_v35 = vmul.f32 %v777_v58, %v1751_v6  ;;  %v775_v45 = vmul.f32 %v1788_v59, %v1751_v6 }
 0x521   :  { %781 = vrot.lane.b32.xlu1 %v779_v35, %s1455_s29 }
 0x526   :  { %v848_v61 = vpop.permute.xlu0 %847  ;;  %v760_v0 = vpop.permute.xlu1 %759 }
 0x527   :  { %v850_v21 = vmul.f32 %v848_v61, %v1782_v49  ;;  %v762_v28 = vmul.f32 %v760_v0, %v1751_v6  ;;  %v509_v0 = vmul.f32 %v1776_v31, %v490_v44 }
 0x529   :  { %597 = vrot.lane.b32.xlu1 %v595_v30, %s1451_s27 }
 0x52e   :  { %v602_v62 = vpop.permute.xlu0 %601  ;;  %v861_v36 = vpop.permute.xlu1 %860 }
 0x52f   :  { %v1796_v2 = vmul.f32 %v602_v62, %v1776_v31  ;;  %v863_v52 = vmul.f32 %v861_v36, %v1782_v49 }
 0x531   :  { %869 = vrot.lane.b32.xlu1 %v867_v1, %s1455_s29 }
 0x536   :  { %v589_v43 = vpop.permute.xlu1 %588 }
 0x537   :  { %v591_v48 = vmul.f32 %v589_v43, %v1776_v31 }
 0x539   :  { %700 = vrot.lane.b32.xlu1 %v685_v5, %s1467_s12 }
 0x53f   :  { %v769_v23 = vpop.permute.xlu2 %768 }
 0x540   :  { %v771_v33 = vsub.f32 %v762_v28, %v769_v23 }
 0x541   :  { %707 = vrot.lane.b32.xlu1 %v685_v5, %s1452_s3 }
 0x56b   :  { %v611_v19 = vpop.permute.xlu0 %610 }
 0x56c   :  { %v613_v20 = vsub.f32 %v1796_v2, %v611_v19 }
 0x573   :  { %v857_v24 = vpop.permute.xlu0 %856 }
 0x574   :  { %v859_v25 = vsub.f32 %v850_v21, %v857_v24 }
 0x576   :  { %881 = vrot.lane.b32.xlu1 %v859_v25, %s1455_s29  ;;  %874 = vrot.lane.b32.xlu0 %v859_v25, %s1451_s27  ;;  %s1469_s29 = smov 9  }
 0x57e   :  { %793 = vrot.lane.b32.xlu1 %v771_v33, %s1467_s12  ;;  %786 = vrot.lane.b32.xlu0 %v771_v33, %s1468_s23 }
 0x586   :  { %505 = vrot.lane.b32.xlu1 %v1716_v16, %s1469_s29 }
 0x58b   :  { %v705_v55 = vpop.permute.xlu0 %704 }
 0x58e   :  { %531 = vrot.lane.b32.xlu1 %v490_v44, %s1456_s8  ;;  %s990_s8 = sshll.u32 %s1951_s17, 4  ;;  %s991_s8 = int_to_ptr.hbm [resolvable:$true] %s990_s8 }
 0x58f   :  { %993 = dma.smem_to_hbm %s1471_s10, 16, %s991_s8, [#allocation16]  }
 0x590   :  { %s1035_s10 = sshll.u32 %s1956_s22, 4  ;;  %s1036_s10 = int_to_ptr.hbm [resolvable:$true] %s1035_s10 }
 0x593   :  { %v782_v46 = vpop.permute.xlu1 %781 }
 0x594   :  { %v784_v47 = vsub.f32 %v775_v45, %v782_v46 }
 0x59b   :  { %v598_v50 = vpop.permute.xlu1 %597 }
 0x59c   :  { %v600_v51 = vsub.f32 %v591_v48, %v598_v50 }
 0x59e   :  { %615 = vrot.lane.b32.xlu0 %v600_v51, %s1452_s3 }
 0x5a3   :  { %v870_v53 = vpop.permute.xlu1 %869 }
 0x5a4   :  { %v872_v26 = vsub.f32 %v863_v52, %v870_v53 }
 0x5a6   :  { %878 = vrot.lane.b32.xlu2 %v872_v26, %s1451_s27  ;;  %744 = vrot.lane.b32.xlu0 %v1651_v63, %s1446_s13 }
 0x5ab   :  { %v701_v60 = vpop.permute.xlu1 %700 }
 0x5ac   :  { %v710_v56 = vsel %vm434_vm4, %v701_v60, %v705_v55 }
 0x5b3   :  { %v708_v54 = vpop.permute.xlu1 %707 }
 0x5b4   :  { %v1822_v57 = vsel %vm436_vm5, %v710_v56, %v708_v54 }
 0x5b5   :  { %v712_v58 = vmul.f32 %v1822_v57, %v1822_v57 }
 0x5b7   :  { %v713_v49 = vsel %vm190_vm0, %v712_v58, 0.0 }
 0x5cf   :  { %714 = vadd.xlane.f32.xlu2 %v713_v49 }
 0x5e7   :  { %790 = vrot.lane.b32.xlu2 %v784_v47, %s1468_s23 }
 0x5e8   :  { %v882_v59 = vpop.permute.xlu1 %881  ;;  %v875_v62 = vpop.permute.xlu0 %874 }
 0x5ef   :  { %619 = vrot.lane.b32.xlu2 %v613_v20, %s1452_s3 }
 0x5f0   :  { %v794_v35 = vpop.permute.xlu1 %793  ;;  %v787_v1 = vpop.permute.xlu0 %786 }
 0x5f7   :  { %622 = vrot.lane.b32.xlu2 %v600_v51, %s1451_s27  ;;  %s972_s27 = sshll.u32 %s1949_s15, 4  ;;  %s963_s15 = sshll.u32 %s1948_s14, 4  ;;  %s973_s27 = int_to_ptr.hbm [resolvable:$true] %s972_s27  ;;  %s964_s15 = int_to_ptr.hbm [resolvable:$true] %s963_s15 }
 0x5f8   :  { %v506_v61 = vpop.permute.xlu1 %505  ;;  %966 = dma.smem_to_hbm %s1473_s4, 16, %s964_s15, [#allocation4]  }
 0x5f9   :  { %v508_v30 = vsub.f32 %v1651_v63, %v506_v61  ;;  %s1475_s14 = smov [#allocation17]  }
 0x5fa   :  { %1002 = dma.smem_to_hbm %s1475_s14, 16, %s1000_s19, [#allocation16]  }
 0x5fb   :  { %660 = vrot.lane.b32.xlu0 %v508_v30, %s1458_s5 }
 0x600   :  { %v879_v4 = vpop.permute.xlu2 %878  ;;  %v532_v13 = vpop.permute.xlu1 %531 }
 0x601   :  { %v884_v5 = vsel %vm434_vm4, %v875_v62, %v879_v4  ;;  %v534_v14 = vmul.f32 %v532_v13, %v1751_v6  ;;  %v552_v45 = vmul.f32 %v532_v13, %v508_v30 }
 0x602   :  { %v1836_v8 = vsel %vm436_vm5, %v884_v5, %v882_v59 }
 0x603   :  { %v886_v10 = vmul.f32 %v1836_v8, %v1836_v8 }
 0x605   :  { %v887_v11 = vsel %vm190_vm0, %v886_v10, 0.0 }
 0x610   :  { %v616_v2 = vpop.permute.xlu0 %615 }
 0x618   :  { %v1833_v7 = vpop.permute.xlu0 %744 }
 0x619   :  { %v830_v9 = vsub.f32 %v1651_v63, %v1833_v7  ;;  %v747_v56 = vsub.f32 %v1716_v16, %v1833_v7 }
 0x61b   :  { %832 = vrot.lane.b32.xlu0 %v830_v9, %s1446_s13 }
 0x620   :  { %888 = vadd.xlane.f32.xlu2 %v887_v11 }
 0x638   :  { %519 = vrot.lane.b32.xlu2 %v490_v44, %s1447_s25  ;;  %s1017_s25 = sshll.u32 %s1954_s20, 4  ;;  %s1026_s20 = sshll.u32 %s1955_s21, 4  ;;  %s1018_s25 = int_to_ptr.hbm [resolvable:$true] %s1017_s25  ;;  %s1027_s20 = int_to_ptr.hbm [resolvable:$true] %s1026_s20 }
 0x640   :  { %918 = vrot.lane.b32.xlu2 %v830_v9, %s1453_s11 }
 0x642   :  { %v715_v12 = vpop.xlane.xlu2 %714 }
 0x643   :  { %1179 = vrsqrt.f32 %v715_v12  ;;  %vm723_vm2 = vcmp.eq.f32.partialorder %v715_v12, inf  ;;  %v726_v40 = vand.u32 2147483648, %v715_v12  ;;  %vm725_vm3 = vcmp.eq.f32.partialorder %v715_v12, 0.0 }
 0x648   :  { %536 = vrot.lane.b32.xlu2 %v534_v14, %s1458_s5 }
 0x649   :  { %v1180_v23 = vpop.eup %1179 }
 0x64a   :  { %v791_v15 = vpop.permute.xlu2 %790  ;;  %v717_v28 = vmul.f32 %v1180_v23, %v715_v12 }
 0x64b   :  { %v796_v63 = vsel %vm434_vm4, %v787_v1, %v791_v15 }
 0x64c   :  { %v1850_v17 = vsel %vm436_vm5, %v796_v63, %v794_v35  ;;  %v718_v29 = vmul.f32 %v1180_v23, %v717_v28 }
 0x64d   :  { %v798_v18 = vmul.f32 %v1850_v17, %v1850_v17 }
 0x64e   :  { %v719_v33 = vmul.f32 0.5, %v718_v29 }
 0x64f   :  { %v799_v19 = vsel %vm190_vm0, %v798_v18, 0.0 }
 0x650   :  { %800 = vadd.xlane.f32.xlu1 %v799_v19  ;;  %v720_v34 = vsub.f32 1.5, %v719_v33 }
 0x652   :  { %v620_v20 = vpop.permute.xlu2 %619  ;;  %v721_v36 = vmul.f32 %v1180_v23, %v720_v34 }
 0x653   :  { %v625_v21 = vsel %vm434_vm4, %v616_v2, %v620_v20 }
 0x654   :  { %v722_v37 = vmul.f32 %v721_v36, %v715_v12 }
 0x656   :  { %v724_v39 = vsel %vm723_vm2, %v715_v12, %v722_v37 }
 0x657   :  { %v727_v41 = vsel %vm725_vm3, %v726_v40, %v724_v39 }
 0x658   :  { %v728_v43 = vadd.f32 1e-06, %v727_v41 }
 0x65a   :  { %v623_v22 = vpop.permute.xlu2 %622  ;;  %1181 = vrcp.f32 %v728_v43  ;;  %v740_v52 = vand.u32 2147483648, %v728_v43  ;;  %vm734_vm7 = vweird.f32 %v728_v43 }
 0x65b   :  { %v1857_v24 = vsel %vm436_vm5, %v625_v21, %v623_v22 }
 0x65c   :  { %v627_v25 = vmul.f32 %v1857_v24, %v1857_v24  ;;  %v741_v53 = vor.u32 1.1754944e-38, %v740_v52 }
 0x65e   :  { %v628_v27 = vsel %vm190_vm0, %v627_v25, 0.0 }
 0x65f   :  { %629 = vadd.xlane.f32.xlu0 %v628_v27 }
 0x660   :  { %v1182_v46 = vpop.eup %1181 }
 0x661   :  { %v730_v47 = vmul.f32 %v1182_v46, %v728_v43  ;;  %vm735_vm6 = vweird.f32 %v1182_v46 }
 0x662   :  { %vm736_vm8 = vmor %vm734_vm7, %vm735_vm6 }
 0x663   :  { %v731_v48 = vsub.f32 1.0, %v730_v47 }
 0x665   :  { %v732_v50 = vmul.f32 %v1182_v46, %v731_v48 }
 0x667   :  { %v733_v51 = vadd.f32 %v1182_v46, %v732_v50 }
 0x66d   :  { %v1876_v58 = vpop.permute.xlu0 %660 }
 0x673   :  { %511 = vrot.lane.b32.xlu0 %v509_v0, %s1446_s13 }
 0x68d   :  { %v1881_v4 = vpop.permute.xlu0 %832 }
 0x693   :  { %v1864_v38 = vpop.xlane.xlu2 %888 }
 0x694   :  { %1183 = vrsqrt.f32 %v1864_v38  ;;  %vm897_vm10 = vcmp.eq.f32.partialorder %v1864_v38, inf  ;;  %v900_v19 = vand.u32 2147483648, %v1864_v38  ;;  %vm899_vm14 = vcmp.eq.f32.partialorder %v1864_v38, 0.0 }
 0x69a   :  { %v1184_v26 = vpop.eup %1183 }
 0x69b   :  { %v520_v42 = vpop.permute.xlu2 %519  ;;  %v891_v54 = vmul.f32 %v1184_v26, %v1864_v38 }
 0x69c   :  { %v522_v31 = vmul.f32 %v520_v42, %v1751_v6  ;;  %v543_v44 = vmul.f32 %v520_v42, %v1744_v3  ;;  %v738_v6 = vand.u32 2147483647, %v728_v43  ;;  %v737_v3 = vsel %vm736_vm8, %v1182_v46, %v733_v51 }
 0x69d   :  { %v892_v49 = vmul.f32 %v1184_v26, %v891_v54 }
 0x69e   :  { %524 = vrot.lane.b32.xlu1 %v522_v31, %s1453_s11  ;;  %545 = vrot.lane.b32.xlu0 %v543_v44, %s1453_s11  ;;  %vm739_vm9 = vcmp.eq.f32.partialorder %v738_v6, 8.507059e+37 }
 0x69f   :  { %v742_v60 = vsel %vm739_vm9, %v741_v53, %v737_v3  ;;  %v893_v30 = vmul.f32 0.5, %v892_v49 }
 0x6a0   :  { %v743_v55 = vmul.f32 %v742_v60, %v1822_v57 }
 0x6a1   :  { %v894_v2 = vsub.f32 1.5, %v893_v30 }
 0x6a2   :  { %v748_v61 = vmul.f32 %v747_v56, %v743_v55 }
 0x6a3   :  { %v1878_v59 = vpop.permute.xlu2 %918  ;;  %v895_v16 = vmul.f32 %v1184_v26, %v894_v2 }
 0x6a4   :  { %v749_v62 = vsel %vm190_vm0, %v748_v61, 0.0 }
 0x6a5   :  { %v896_v12 = vmul.f32 %v895_v16, %v1864_v38 }
 0x6a6   :  { %554 = vrot.lane.b32.xlu1 %v552_v45, %s1458_s5  ;;  %s1470_s5 = smov [#allocation12]  }
 0x6a7   :  { %v898_v63 = vsel %vm897_vm10, %v1864_v38, %v896_v12  ;;  %975 = dma.smem_to_hbm %s1470_s5, 16, %s973_s27, [#allocation13]  }
 0x6a8   :  { %v901_v25 = vsel %vm899_vm14, %v900_v19, %v898_v63  ;;  %984 = dma.smem_to_hbm %s1474_s0, 16, %s982_s30, [#allocation13]  }
 0x6a9   :  { %v902_v23 = vadd.f32 1e-06, %v901_v25  ;;  %s1476_s27 = smov [#allocation20]  }
 0x6aa   :  { %1020 = dma.smem_to_hbm %s1476_s27, 16, %s1018_s25, [#allocation19]  }
 0x6ab   :  { %v537_v5 = vpop.permute.xlu2 %536  ;;  %vm908_vm10 = vweird.f32 %v902_v23  ;;  %v914_v2 = vand.u32 2147483648, %v902_v23 }
 0x6ac   :  { %v539_v10 = vsel %vm190_vm0, %v537_v5, 0.0 }
 0x6ad   :  { %v915_v16 = vor.u32 1.1754944e-38, %v914_v2 }
 0x6c3   :  { %v801_v35 = vpop.xlane.xlu1 %800 }
 0x6c4   :  { %1185 = vrsqrt.f32 %v801_v35  ;;  %vm809_vm11 = vcmp.eq.f32.partialorder %v801_v35, inf  ;;  %v812_v18 = vand.u32 2147483648, %v801_v35  ;;  %vm811_vm12 = vcmp.eq.f32.partialorder %v801_v35, 0.0 }
 0x6c8   :  { %750 = vadd.xlane.f32.xlu0 %v749_v62 }
 0x6ca   :  { %v1186_v1 = vpop.eup %1185 }
 0x6cb   :  { %v803_v57 = vmul.f32 %v1186_v1, %v801_v35 }
 0x6cd   :  { %v804_v9 = vmul.f32 %v1186_v1, %v803_v57 }
 0x6cf   :  { %v805_v7 = vmul.f32 0.5, %v804_v9 }
 0x6d0   :  { %540 = vadd.xlane.f32.xlu1 %v539_v10 }
 0x6d1   :  { %v806_v11 = vsub.f32 1.5, %v805_v7 }
 0x6d2   :  { %v630_v13 = vpop.xlane.xlu0 %629 }
 0x6d3   :  { %v807_v14 = vmul.f32 %v1186_v1, %v806_v11  ;;  %1187 = vrsqrt.f32 %v630_v13  ;;  %vm638_vm15 = vcmp.eq.f32.partialorder %v630_v13, inf  ;;  %vm640_vm1 = vcmp.eq.f32.partialorder %v630_v13, 0.0 }
 0x6d4   :  { %v641_v41 = vand.u32 2147483648, %v630_v13 }
 0x6d5   :  { %v808_v15 = vmul.f32 %v807_v14, %v801_v35 }
 0x6d7   :  { %v810_v20 = vsel %vm809_vm11, %v801_v35, %v808_v15 }
 0x6d8   :  { %v813_v21 = vsel %vm811_vm12, %v812_v18, %v810_v20 }
 0x6d9   :  { %v1188_v22 = vpop.eup %1187  ;;  %v814_v27 = vadd.f32 1e-06, %v813_v21 }
 0x6da   :  { %v632_v0 = vmul.f32 %v1188_v22, %v630_v13 }
 0x6db   :  { %1189 = vrcp.f32 %v814_v27  ;;  %v824_v42 = vand.u32 2147483647, %v814_v27  ;;  %v826_v43 = vand.u32 2147483648, %v814_v27  ;;  %vm820_vm3 = vweird.f32 %v814_v27 }
 0x6dc   :  { %v633_v28 = vmul.f32 %v1188_v22, %v632_v0  ;;  %1191 = vrcp.f32 %v902_v23 }
 0x6dd   :  { %v827_v52 = vor.u32 1.1754944e-38, %v826_v43  ;;  %vm825_vm7 = vcmp.eq.f32.partialorder %v824_v42, 8.507059e+37 }
 0x6de   :  { %v634_v29 = vmul.f32 0.5, %v633_v28 }
 0x6e0   :  { %v635_v33 = vsub.f32 1.5, %v634_v29 }
 0x6e1   :  { %v1190_v34 = vpop.eup %1189 }
 0x6e2   :  { %v636_v36 = vmul.f32 %v1188_v22, %v635_v33  ;;  %v816_v37 = vmul.f32 %v1190_v34, %v814_v27  ;;  %v1192_v31 = vpop.eup %1191  ;;  %vm821_vm2 = vweird.f32 %v1190_v34 }
 0x6e3   :  { %v904_v51 = vmul.f32 %v1192_v31, %v902_v23  ;;  %vm822_vm6 = vmor %vm820_vm3, %vm821_vm2  ;;  %vm909_vm8 = vweird.f32 %v1192_v31  ;;  %vm565_vm2 = vcmask 31744   ;;  %vm567_vm3 = vcmask 33792  }
 0x6e4   :  { %v637_v39 = vmul.f32 %v636_v36, %v630_v13  ;;  %v817_v40 = vsub.f32 1.0, %v816_v37  ;;  %vm910_vm11 = vmor %vm908_vm10, %vm909_vm8 }
 0x6e5   :  { %v512_v38 = vpop.permute.xlu0 %511  ;;  %v905_v26 = vsub.f32 1.0, %v904_v51 }
 0x6e6   :  { %v639_v44 = vsel %vm638_vm15, %v630_v13, %v637_v39  ;;  %v514_v45 = vsel %vm190_vm0, %v512_v38, 0.0  ;;  %v818_v46 = vmul.f32 %v1190_v34, %v817_v40 }
 0x6e7   :  { %v642_v47 = vsel %vm640_vm1, %v641_v41, %v639_v44  ;;  %515 = vadd.xlane.f32.xlu2 %v514_v45  ;;  %v906_v56 = vmul.f32 %v1192_v31, %v905_v26 }
 0x6e8   :  { %v643_v48 = vadd.f32 1e-06, %v642_v47  ;;  %v819_v50 = vadd.f32 %v1190_v34, %v818_v46 }
 0x6e9   :  { %v907_v30 = vadd.f32 %v1192_v31, %v906_v56 }
 0x6ea   :  { %1193 = vrcp.f32 %v643_v48  ;;  %v823_v6 = vsel %vm822_vm6, %v1190_v34, %v819_v50  ;;  %v655_v61 = vand.u32 2147483648, %v643_v48  ;;  %v653_v1 = vand.u32 2147483647, %v643_v48 }
 0x6eb   :  { %v828_v3 = vsel %vm825_vm7, %v827_v52, %v823_v6  ;;  %vm649_vm12 = vweird.f32 %v643_v48  ;;  %v911_v5 = vsel %vm910_vm11, %v1192_v31, %v907_v30  ;;  %v1477_v52 = vmov 10.0  }
 0x6ec   :  { %v829_v53 = vmul.f32 %v828_v3, %v1850_v17  ;;  %v912_v17 = vand.u32 2147483647, %v902_v23  ;;  %vm654_vm15 = vcmp.eq.f32.partialorder %v653_v1, 8.507059e+37  ;;  %1195 = vrcp.f32 %v1477_v52 }
 0x6ee   :  { %v835_v60 = vmul.f32 %v1881_v4, %v829_v53  ;;  %v656_v4 = vor.u32 1.1754944e-38, %v655_v61  ;;  %vm913_vm1 = vcmp.eq.f32.partialorder %v912_v17, 8.507059e+37 }
 0x6ef   :  { %v916_v11 = vsel %vm913_vm1, %v915_v16, %v911_v5 }
 0x6f0   :  { %v1194_v54 = vpop.eup %1193  ;;  %v836_v55 = vsel %vm190_vm0, %v835_v60, 0.0  ;;  %v917_v13 = vmul.f32 %v916_v11, %v1836_v8 }
 0x6f1   :  { %837 = vadd.xlane.f32.xlu1 %v836_v55  ;;  %v645_v49 = vmul.f32 %v1194_v54, %v643_v48  ;;  %vm650_vm9 = vweird.f32 %v1194_v54 }
 0x6f2   :  { %vm651_vm14 = vmor %vm649_vm12, %vm650_vm9  ;;  %v921_v15 = vmul.f32 %v1878_v59, %v917_v13  ;;  %v1196_v3 = vpop.eup %1195 }
 0x6f3   :  { %v646_v35 = vsub.f32 1.0, %v645_v49  ;;  %v579_v26 = vmul.f32 10.0, %v1196_v3 }
 0x6f4   :  { %v922_v63 = vsel %vm190_vm0, %v921_v15, 0.0 }
 0x6f5   :  { %v647_v62 = vmul.f32 %v1194_v54, %v646_v35 }
 0x6f7   :  { %v648_v57 = vadd.f32 %v1194_v54, %v647_v62 }
 0x6f9   :  { %v652_v9 = vsel %vm651_vm14, %v1194_v54, %v648_v57  ;;  %v580_v54 = vsub.f32 1.0, %v579_v26 }
 0x6fa   :  { %v657_v7 = vsel %vm654_vm15, %v656_v4, %v652_v9 }
 0x6fb   :  { %v658_v10 = vmul.f32 %v657_v7, %v1857_v24  ;;  %v581_v61 = vmul.f32 %v1196_v3, %v580_v54 }
 0x6fd   :  { %v663_v12 = vmul.f32 %v1876_v58, %v658_v10  ;;  %v582_v2 = vadd.f32 %v1196_v3, %v581_v61 }
 0x6ff   :  { %v664_v14 = vsel %vm190_vm0, %v663_v12, 0.0 }
 0x700   :  { %665 = vadd.xlane.f32.xlu2 %v664_v14 }
 0x708   :  { %923 = vadd.xlane.f32.xlu2 %v922_v63 }
 0x710   :  { %v525_v18 = vpop.permute.xlu1 %524  ;;  %v546_v20 = vpop.permute.xlu0 %545 }
 0x711   :  { %v527_v19 = vsel %vm190_vm0, %v525_v18, 0.0  ;;  %v548_v58 = vsel %vm190_vm0, %v546_v20, 0.0 }
 0x712   :  { %528 = vadd.xlane.f32.xlu0 %v527_v19 }
 0x718   :  { %v555_v21 = vpop.permute.xlu1 %554 }
 0x719   :  { %v557_v24 = vsel %vm190_vm0, %v555_v21, 0.0  ;;  %vm563_vm0 = vcmask 23552  }
 0x71a   :  { %558 = vadd.xlane.f32.xlu1 %v557_v24  ;;  %549 = vadd.xlane.f32.xlu0 %v548_v58 }
 0x73b   :  { %v751_v25 = vpop.xlane.xlu0 %750 }
 0x73c   :  { %v752_v0 = vmul.f32 %v751_v25, %v751_v25 }
 0x743   :  { %v541_v22 = vpop.xlane.xlu1 %540 }
 0x744   :  { %v542_v31 = vmul.f32 %v541_v22, %v541_v22 }
 0x75a   :  { %v516_v8 = vpop.xlane.xlu2 %515 }
 0x75b   :  { %v517_v42 = vmul.f32 %v516_v8, %v516_v8 }
 0x764   :  { %v838_v23 = vpop.xlane.xlu1 %837 }
 0x765   :  { %v839_v29 = vmul.f32 %v838_v23, %v838_v23 }
 0x773   :  { %v666_v27 = vpop.xlane.xlu2 %665 }
 0x774   :  { %v667_v59 = vmul.f32 %v666_v27, %v666_v27 }
 0x776   :  { %v753_v28 = vadd.f32 %v752_v0, %v667_v59 }
 0x778   :  { %v840_v34 = vadd.f32 %v839_v29, %v753_v28 }
 0x77b   :  { %v924_v33 = vpop.xlane.xlu2 %923 }
 0x77c   :  { %v925_v36 = vmul.f32 %v924_v33, %v924_v33 }
 0x77e   :  { %v926_v37 = vadd.f32 %v925_v36, %v840_v34 }
 0x780   :  { %v934_v39 = vmul.f32 %v926_v37, %v1760_v32 }
 0x782   :  { %v935_v40 = vsel %vm159_vm13, %v934_v39, 0.0  ;;  %vm583_vm13 = vweird.f32 %v1196_v3 }
 0x783   :  { %936 = vadd.xlane.f32.xlu0 %v935_v40  ;;  %v584_v5 = vsel %vm583_vm13, %v1196_v3, %v582_v2 }
 0x785   :  { %v529_v41 = vpop.xlane.xlu0 %528 }
 0x786   :  { %v530_v38 = vmul.f32 %v529_v41, %v529_v41 }
 0x788   :  { %v561_v43 = vsel %vm434_vm4, %v517_v42, %v530_v38 }
 0x789   :  { %v562_v48 = vsel %vm436_vm5, %v561_v43, %v542_v31 }
 0x78d   :  { %v559_v44 = vpop.xlane.xlu1 %558  ;;  %v550_v45 = vpop.xlane.xlu0 %549 }
 0x78e   :  { %v560_v46 = vmul.f32 %v559_v44, %v559_v44  ;;  %v551_v47 = vmul.f32 %v550_v45, %v550_v45 }
 0x790   :  { %v564_v50 = vsel %vm563_vm0, %v562_v48, %v551_v47 }
 0x791   :  { %v566_v32 = vsel %vm565_vm2, %v564_v50, %v560_v46 }
 0x792   :  { %v568_v51 = vsel %vm567_vm3, %v566_v32, 0.0 }
 0x793   :  { %569 = vadd.xlane.f32.xlu2 %v568_v51 }
 0x7f6   :  { %v937_v6 = vpop.xlane.xlu0 %936 }
 0x7f7   :  { %v938_v53 = vrot.slane %v937_v6, 4 }
 0x7f9   :  { %v939_v60 = vadd.f32 %v938_v53, %v937_v6 }
 0x7fb   :  { %v940_v56 = vrot.slane %v939_v60, 2 }
 0x7fd   :  { %v941_v30 = vadd.f32 %v940_v56, %v939_v60 }
 0x7ff   :  { %v942_v57 = vrot.slane %v941_v30, 1 }
 0x801   :  { %v943_v9 = vadd.f32 %v942_v57, %v941_v30 }
 0x806   :  { %v570_v55 = vpop.xlane.xlu2 %569 }
 0x807   :  { %v571_v49 = vrot.slane %v570_v55, 4 }
 0x809   :  { %v572_v35 = vadd.f32 %v571_v49, %v570_v55 }
 0x80b   :  { %v573_v62 = vrot.slane %v572_v35, 2 }
 0x80d   :  { %v574_v1 = vadd.f32 %v573_v62, %v572_v35 }
 0x80f   :  { %v575_v17 = vrot.slane %v574_v1, 1 }
 0x811   :  { %v576_v4 = vadd.f32 %v575_v17, %v574_v1 }
 0x813   :  { %1109 = vpush %v576_v4 }
 0x814   :  { %1111 = vpush %v584_v5 }
 0x815   :  { %1113 = vpush %v943_v9 }
 0x844   :  { %s1110_s3 = spop %1109 }
 0x845   :  { %s1112_s11 = spop %1111 }
 0x846   :  { %s586_s7 = smul.f32 %s1112_s11, %s1110_s3  ;;  %s1114_s1 = spop %1113 }
 0x847   :  { %s953_s9 = smul.f32 %s1114_s1, %s1736_s2 }
 0x848   :  { %955 = sst [smem:[#allocation21]] %s586_s7 }
 0x849   :  { %957 = sst [smem:[#allocation23]] %s953_s9 }
 0x84a   :  { %1029 = dma.smem_to_hbm %s1478_s24, 16, %s1027_s20, [#allocation22]  }
 0x84b   :  { %1038 = dma.smem_to_hbm %s1479_s6, 16, %s1036_s10, [#allocation22]  }
 0x84c   :  { %1431 = dma.done.wait [#allocation4], 16  }
 0x84d   :  { %1432 = vsyncadd [#allocation4], 4294967280 }
 0x84e   :  { %1433 = dma.done.wait [#allocation13], 32  }
 0x84f   :  { %1434 = vsyncadd [#allocation13], 4294967264 }
 0x850   :  { %1435 = dma.done.wait [#allocation16], 32  }
 0x851   :  { %1436 = vsyncadd [#allocation16], 4294967264 }
 0x852   :  { %1437 = dma.done.wait [#allocation19], 32  }
 0x853   :  { %1438 = vsyncadd [#allocation19], 4294967264 }
 0x854   :  { %1439 = dma.done.wait [#allocation22], 32  }
 0x855   :  { %1440 = vsyncadd [#allocation22], 4294967264 }
 0x856   :  { %1075 = sfence }
 0x857   :  { %1076 = vsyncpa [#allocation3], 1 }
 0x858   :  { %1077 = vsyncpa [#allocation6], 1 }
 0x859   :  { %1078 = vsyncpa [#allocation9], 1 }
 0x85a   :  { %1079 = vsyncpa [#allocation4], 1 }
 0x85b   :  { %1080 = vsyncpa [#allocation13], 1 }
 0x85c   :  { %1081 = vsyncpa [#allocation16], 1 }
 0x85d   :  { %1082 = vsyncpa [#allocation19], 1 }
 0x85e   :  { %1083 = vsyncpa [#allocation22], 1 }

</bundles_post_ra>
